<compile_context>
chip_gen: v7x
topology: tpu7x:2x2x1
jax: 0.10.0
libtpu: 0.0.40
codegen_flags: <defaults>
</compile_context>

<pallas_src>
import functools

import jax
import jax.numpy as jnp
from jax import lax
from jax.experimental import pallas as pl
from jax.experimental.pallas import tpu as pltpu

COMPUTE_DTYPE = jnp.bfloat16          # MXU-native operand dtype on v5e/v6e/v7x
VMEM_LIMIT = 32 * 1024 * 1024         # generous for these working sets, v7x-safe
LN_EPS = 1e-5


def _round_up(x, m):
    return (x + m - 1) // m * m


def _ln(x, g, b, eps):
    """Row LayerNorm in f32. x: (M, D) f32, g/b: (1, D)."""
    mean = jnp.mean(x, axis=-1, keepdims=True)
    c = x - mean
    var = jnp.mean(c * c, axis=-1, keepdims=True)
    return c * lax.rsqrt(var + eps) * g.astype(jnp.float32) + b.astype(jnp.float32)


# ----------------------------------------------------------------------------
# Kernel 1: CLIP vision embeddings + pre_layrnorm + sequence MLP (fused).
# One grid step per batch element; emits the padded encoder input slab.
# ----------------------------------------------------------------------------
def _embed_kernel(patches_ref, pw_ref, cls_ref, pos_ref, pre_g_ref, pre_b_ref,
                  seq_ref, w0_ref, b0_ref, w1_ref, b1_ref, w2_ref, b2_ref,
                  o_ref, *, n_img, s_pad, eps):
    hidden = o_ref.shape[-1]

    # --- CLIP vision embeddings: patch conv (as matmul, bias=False) ----------
    pe = jnp.dot(patches_ref[...], pw_ref[...],
                 preferred_element_type=jnp.float32)                  # (n_patch, hidden)
    emb = jnp.concatenate([cls_ref[...].astype(jnp.float32), pe], axis=0)
    emb = emb + pos_ref[...].astype(jnp.float32)                      # (n_img, hidden)
    img = _ln(emb, pre_g_ref[...], pre_b_ref[...], eps)               # pre_layrnorm

    # --- sequence MLP: mlp_in -> 256 -> 1024 -> hidden (ReLU between) --------
    h = jnp.dot(seq_ref[...], w0_ref[...], preferred_element_type=jnp.float32)
    h = jnp.maximum(h + b0_ref[...].astype(jnp.float32), 0.0)
    h = jnp.dot(h.astype(w1_ref.dtype), w1_ref[...],
                preferred_element_type=jnp.float32)
    h = jnp.maximum(h + b1_ref[...].astype(jnp.float32), 0.0)
    h = jnp.dot(h.astype(w2_ref.dtype), w2_ref[...],
                preferred_element_type=jnp.float32)
    seq_emb = h + b2_ref[...].astype(jnp.float32)                     # (1, hidden)

    parts = [img, seq_emb]
    if s_pad > n_img + 1:                                             # zero pad rows
        parts.append(jnp.zeros((s_pad - n_img - 1, hidden), jnp.float32))
    o_ref[...] = jnp.concatenate(parts, axis=0).astype(o_ref.dtype)


def pallas_embed(patches, seq_flat, p, s_pad):
    B, n_patch, cpp = patches.shape
    hidden = p["patch_w"].shape[1]
    n_img = n_patch + 1
    mlp = p["mlp"]

    def full2d(a):
        return pl.BlockSpec(a.shape, lambda b: (0, 0))

    in_specs = [
        pl.BlockSpec((None, n_patch, cpp), lambda b: (b, 0, 0)),
        full2d(p["patch_w"]),
        full2d(p["class_emb"]),
        full2d(p["pos_emb"]),
        full2d(p["pre_ln_g"]),
        full2d(p["pre_ln_b"]),
        pl.BlockSpec((None, 1, seq_flat.shape[-1]), lambda b: (b, 0, 0)),
        full2d(mlp["w0"]), full2d(mlp["b0"]),
        full2d(mlp["w1"]), full2d(mlp["b1"]),
        full2d(mlp["w2"]), full2d(mlp["b2"]),
    ]
    kernel = functools.partial(_embed_kernel, n_img=n_img, s_pad=s_pad, eps=LN_EPS)
    return pl.pallas_call(
        kernel,
        grid=(B,),
        in_specs=in_specs,
        out_specs=pl.BlockSpec((None, s_pad, hidden), lambda b: (b, 0, 0)),
        out_shape=jax.ShapeDtypeStruct((B, s_pad, hidden), jnp.float32),
        compiler_params=pltpu.CompilerParams(
            dimension_semantics=("parallel",),
            vmem_limit_bytes=VMEM_LIMIT),
    )(patches, p["patch_w"], p["class_emb"], p["pos_emb"],
      p["pre_ln_g"], p["pre_ln_b"], seq_flat,
      mlp["w0"], mlp["b0"], mlp["w1"], mlp["b1"], mlp["w2"], mlp["b2"])


# ----------------------------------------------------------------------------
# Kernel 2: fused CLIP encoder layer, grid=(B, layers).
# LN1 -> fused QKV matmul -> multi-head attention -> out-proj + residual ->
# LN2 -> FC1 (quick_gelu) -> FC2 + residual, all in one grid step.
# x is carried in an f32 VMEM scratch across the layers axis; stacked per-layer
# weights are prefetched by the BlockSpec pipeline.  The pooled (post-LN CLS)
# output is produced in the last layer's epilogue.
# ----------------------------------------------------------------------------
def _encoder_layer_kernel(x0_ref,
                          ln1_g_ref, ln1_b_ref, wqkv_ref, bqkv_ref, wo_ref, bo_ref,
                          ln2_g_ref, ln2_b_ref, wfc1_ref, bfc1_ref, wfc2_ref, bfc2_ref,
                          post_g_ref, post_b_ref,
                          out_ref, pooled_ref, x_sc,
                          *, heads, hd, n_valid, eps):
    l = pl.program_id(1)
    s_pad, hidden = x_sc.shape

    @pl.when(l == 0)
    def _():
        x_sc[...] = x0_ref[...].astype(jnp.float32)

    x = x_sc[...]

    # ---- self-attention block (pre-LN) --------------------------------------
    h = _ln(x, ln1_g_ref[...], ln1_b_ref[...], eps).astype(wqkv_ref.dtype)
    qkv = jnp.dot(h, wqkv_ref[...], preferred_element_type=jnp.float32)
    qkv = qkv + bqkv_ref[...].astype(jnp.float32)                     # (s_pad, 3*hidden)

    def heads_major(t):                                               # (s_pad, hidden) -> (heads, s_pad, hd)
        return jnp.swapaxes(t.reshape(s_pad, heads, hd), 0, 1)

    q = heads_major(qkv[:, :hidden].astype(COMPUTE_DTYPE))            # query scale pre-folded
    k = heads_major(qkv[:, hidden:2 * hidden].astype(COMPUTE_DTYPE))
    v = heads_major(qkv[:, 2 * hidden:].astype(COMPUTE_DTYPE))

    s = jnp.einsum('hqd,hkd->hqk', q, k,
                   preferred_element_type=jnp.float32)                # (heads, s_pad, s_pad)
    if n_valid < s_pad:                                               # mask padded key rows
        kidx = lax.broadcasted_iota(jnp.int32, (1, 1, s_pad), 2)
        s = jnp.where(kidx < n_valid, s, -1e30)
    m = jnp.max(s, axis=-1, keepdims=True)
    p = jnp.exp(s - m)
    p = p / jnp.sum(p, axis=-1, keepdims=True)                        # exact softmax
    o = jnp.einsum('hqk,hkd->hqd', p.astype(v.dtype), v,
                   preferred_element_type=jnp.float32)                # (heads, s_pad, hd)
    attn = jnp.swapaxes(o, 0, 1).reshape(s_pad, hidden)

    attn = jnp.dot(attn.astype(wo_ref.dtype), wo_ref[...],
                   preferred_element_type=jnp.float32)
    x = x + attn + bo_ref[...].astype(jnp.float32)                    # residual

    # ---- MLP block (pre-LN, quick_gelu) --------------------------------------
    h = _ln(x, ln2_g_ref[...], ln2_b_ref[...], eps).astype(wfc1_ref.dtype)
    h = jnp.dot(h, wfc1_ref[...], preferred_element_type=jnp.float32)
    h = h + bfc1_ref[...].astype(jnp.float32)
    h = h * jax.nn.sigmoid(1.702 * h)                                 # quick_gelu
    h = jnp.dot(h.astype(wfc2_ref.dtype), wfc2_ref[...],
                preferred_element_type=jnp.float32)
    x = x + h + bfc2_ref[...].astype(jnp.float32)                     # residual

    x_sc[...] = x

    @pl.when(l == pl.num_programs(1) - 1)
    def _():
        out_ref[...] = x.astype(out_ref.dtype)
        pooled = _ln(x[0:1, :], post_g_ref[...], post_b_ref[...], eps)
        pooled_ref[...] = pooled.astype(pooled_ref.dtype)


def pallas_encoder(x0, p, cfg, s_pad, n_valid):
    B = x0.shape[0]
    hidden, heads = cfg["hidden"], cfg["heads"]
    hd = hidden // heads
    L = cfg["layers"]
    lp = p["enc"]

    def layer_spec(a):    # stacked (L, r, c) -> per-layer (r, c) view
        return pl.BlockSpec((None,) + a.shape[1:], lambda b, l: (l, 0, 0))

    def batch_spec(a):
        return pl.BlockSpec((None,) + a.shape[1:], lambda b, l: (b, 0, 0))

    def const_spec(a):
        return pl.BlockSpec(a.shape, lambda b, l: (0, 0))

    in_specs = [batch_spec(x0)]
    args = [x0]
    for name in ("ln1_g", "ln1_b", "w_qkv", "b_qkv", "wo", "bo",
                 "ln2_g", "ln2_b", "w_fc1", "b_fc1", "w_fc2", "b_fc2"):
        in_specs.append(layer_spec(lp[name]))
        args.append(lp[name])
    in_specs += [const_spec(p["post_ln_g"]), const_spec(p["post_ln_b"])]
    args += [p["post_ln_g"], p["post_ln_b"]]

    kernel = functools.partial(_encoder_layer_kernel, heads=heads, hd=hd,
                               n_valid=n_valid, eps=LN_EPS)
    out_shapes = (jax.ShapeDtypeStruct((B, s_pad, hidden), jnp.float32),
                  jax.ShapeDtypeStruct((B, 1, hidden), jnp.float32))
    out_specs = (pl.BlockSpec((None, s_pad, hidden), lambda b, l: (b, 0, 0)),
                 pl.BlockSpec((None, 1, hidden), lambda b, l: (b, 0, 0)))
    return pl.pallas_call(
        kernel,
        grid=(B, L),
        in_specs=in_specs,
        out_specs=out_specs,
        out_shape=out_shapes,
        scratch_shapes=[pltpu.VMEM((s_pad, hidden), jnp.float32)],
        compiler_params=pltpu.CompilerParams(
            dimension_semantics=("parallel", "arbitrary"),
            vmem_limit_bytes=VMEM_LIMIT),
    )(*args)


# ----------------------------------------------------------------------------
# Parameter construction (deterministic, synthetic), per-layer weights stacked.
# ----------------------------------------------------------------------------
def init_params(key, cfg):
    hidden, inter, heads = cfg["hidden"], cfg["inter"], cfg["heads"]
    hd = hidden // heads
    scale = hd ** -0.5
    L = cfg["layers"]
    keys = iter(jax.random.split(key, 64 + 8 * L))
    cdt = COMPUTE_DTYPE

    def nrm(shape, sd=0.02, dtype=cdt):
        return (sd * jax.random.normal(next(keys), shape)).astype(dtype)

    zeros = lambda shp: jnp.zeros(shp, jnp.float32)
    ones = lambda shp: jnp.ones(shp, jnp.float32)

    p = {}
    # nn.Sequential MLP: mlp_in -> 256 -> 1024 -> hidden
    p["mlp"] = dict(
        w0=nrm((cfg["mlp_in"], 256)), b0=zeros((1, 256)),
        w1=nrm((256, 1024)), b1=zeros((1, 1024)),
        w2=nrm((1024, hidden)), b2=zeros((1, hidden)),
    )
    # CLIPVisionEmbeddings (conv as matmul, bias=False) + pre/post layernorms
    p["patch_w"] = nrm((cfg["C"] * cfg["patch"] ** 2, hidden))
    p["class_emb"] = nrm((1, hidden), dtype=jnp.float32)
    num_pos = (cfg["img"] // cfg["patch"]) ** 2 + 1
    p["pos_emb"] = nrm((num_pos, hidden), dtype=jnp.float32)
    p["pre_ln_g"], p["pre_ln_b"] = ones((1, hidden)), zeros((1, hidden))
    p["post_ln_g"], p["post_ln_b"] = ones((1, hidden)), zeros((1, hidden))

    # encoder layers — QKV fused, CLIP query scale folded into wq / bq,
    # stacked with a leading `layers` dim for the (B, layers) grid pipeline.
    def make_wqkv():
        wq = nrm((hidden, hidden), dtype=jnp.float32)
        wk = nrm((hidden, hidden), dtype=jnp.float32)
        wv = nrm((hidden, hidden), dtype=jnp.float32)
        return jnp.concatenate([wq * scale, wk, wv], axis=1).astype(cdt)

    def stack(fn):
        return jnp.stack([fn() for _ in range(L)], axis=0)

    p["enc"] = dict(
        ln1_g=stack(lambda: ones((1, hidden))),
        ln1_b=stack(lambda: zeros((1, hidden))),
        w_qkv=stack(make_wqkv),
        b_qkv=stack(lambda: zeros((1, 3 * hidden))),   # q-part would be pre-scaled if nonzero
        wo=stack(lambda: nrm((hidden, hidden))),
        bo=stack(lambda: zeros((1, hidden))),
        ln2_g=stack(lambda: ones((1, hidden))),
        ln2_b=stack(lambda: zeros((1, hidden))),
        w_fc1=stack(lambda: nrm((hidden, inter))),
        b_fc1=stack(lambda: zeros((1, inter))),
        w_fc2=stack(lambda: nrm((inter, hidden))),
        b_fc2=stack(lambda: zeros((1, hidden))),
    )
    return p


# ----------------------------------------------------------------------------
# CLIPPlus forward (reconstruction=False branch)
# ----------------------------------------------------------------------------
def clip_plus_forward(params, pixel_values, sequence, cfg):
    B = pixel_values.shape[0]
    p_sz, C, H = cfg["patch"], cfg["C"], cfg["img"]
    Hp = H // p_sz
    n_patch = Hp * Hp
    n_img = n_patch + 1
    S = n_img + 1                               # image tokens (+CLS) + sequence token
    s_pad = _round_up(S, 16)                    # sublane-align (bf16 packs 16 rows/vreg)

    # --- sequence branch: keep [0,1] + columns >=2 of every row --------------
    S1, S2 = sequence.shape[1], sequence.shape[2]
    idx = jnp.array([0, 1] + [S2 * i + j for i in range(S1) for j in range(2, S2)],
                    dtype=jnp.int32)
    seq_flat = sequence.reshape(B, -1)[:, idx].astype(COMPUTE_DTYPE)[:, None, :]

    # --- patchify conv -> matmul operands (pure layout plumbing) -------------
    patches = (pixel_values
               .reshape(B, C, Hp, p_sz, Hp, p_sz)
               .transpose(0, 2, 4, 1, 3, 5)
               .reshape(B, n_patch, C * p_sz * p_sz)).astype(COMPUTE_DTYPE)

    # --- fused embeddings + pre_layrnorm + sequence MLP -----------------------
    x0 = pallas_embed(patches, seq_flat, params, s_pad)     # (B, s_pad, hidden) f32

    # --- fused CLIP encoder (all layers) + post_layernorm on CLS --------------
    last_pad, pooled = pallas_encoder(x0, params, cfg, s_pad, n_valid=S)
    last_hidden_state = last_pad[:, :S, :]
    pooled_output = pooled[:, 0, :]
    # TODO(synk): HF return_dict / output_attentions / output_hidden_states
    # bookkeeping (pure Python container plumbing) is not reproduced.
    return last_hidden_state, pooled_output


# ----------------------------------------------------------------------------
if __name__ == "__main__":
    cfg = dict(
        B=2, C=3, img=32, patch=8,          # 16 patches + CLS -> 17 image tokens
        hidden=64, layers=2, heads=4,       # head_dim = 16
        inter=512,
        S1=4, S2=4,                         # sequence (B, 4, 4)
    )
    cfg["mlp_in"] = 2 + cfg["S1"] * (cfg["S2"] - 2)   # = 10 (reconstruction=False)

    key = jax.random.PRNGKey(0)
    k_param, k_px, k_seq = jax.random.split(key, 3)
    params = init_params(k_param, cfg)

    pixel_values = jax.random.normal(
        k_px, (cfg["B"], cfg["C"], cfg["img"], cfg["img"]), dtype=jnp.float32)
    sequence = jax.random.normal(
        k_seq, (cfg["B"], cfg["S1"], cfg["S2"]), dtype=jnp.float32)

    last_hidden_state, pooled_output = clip_plus_forward(params, pixel_values, sequence, cfg)
    jax.block_until_ready((last_hidden_state, pooled_output))

    n_tokens = (cfg["img"] // cfg["patch"]) ** 2 + 1 + 1   # image tokens + CLS + seq token
    assert last_hidden_state.shape == (cfg["B"], n_tokens, cfg["hidden"])
    assert pooled_output.shape == (cfg["B"], cfg["hidden"])
    assert bool(jnp.all(jnp.isfinite(last_hidden_state)))
    assert bool(jnp.all(jnp.isfinite(pooled_output)))
    print("KERNEL_OK")
</pallas_src>

<mosaic_0001>
module attributes {stable_mosaic.version = 11 : i64} {
  func.func @_embed_kernel(%arg0: i32, %arg1: memref<1x16x192xbf16, #tpu.memory_space<vmem>>, %arg2: memref<192x64xbf16, #tpu.memory_space<vmem>>, %arg3: memref<1x64xf32, #tpu.memory_space<vmem>>, %arg4: memref<17x64xf32, #tpu.memory_space<vmem>>, %arg5: memref<1x64xf32, #tpu.memory_space<vmem>>, %arg6: memref<1x64xf32, #tpu.memory_space<vmem>>, %arg7: memref<1x1x10xbf16, #tpu.memory_space<vmem>>, %arg8: memref<10x256xbf16, #tpu.memory_space<vmem>>, %arg9: memref<1x256xf32, #tpu.memory_space<vmem>>, %arg10: memref<256x1024xbf16, #tpu.memory_space<vmem>>, %arg11: memref<1x1024xf32, #tpu.memory_space<vmem>>, %arg12: memref<1024x64xbf16, #tpu.memory_space<vmem>>, %arg13: memref<1x64xf32, #tpu.memory_space<vmem>>, %arg14: memref<1x32x64xf32, #tpu.memory_space<vmem>>) attributes {dimension_semantics = [#tpu.dimension_semantics<parallel>], iteration_bounds = array<i64: 2>, scalar_prefetch = 0 : i64, scratch_operands = 0 : i64, tpu.core_type = #tpu.core_type<tc>, window_params = [{transform_indices = @transform_0, window_bounds = array<i64: 1, 16, 192>}, {pipeline_mode = #tpu.pipeline_mode<synchronous>, transform_indices = @transform_1, window_bounds = array<i64: 192, 64>}, {pipeline_mode = #tpu.pipeline_mode<synchronous>, transform_indices = @transform_2, window_bounds = array<i64: 1, 64>}, {pipeline_mode = #tpu.pipeline_mode<synchronous>, transform_indices = @transform_3, window_bounds = array<i64: 17, 64>}, {pipeline_mode = #tpu.pipeline_mode<synchronous>, transform_indices = @transform_4, window_bounds = array<i64: 1, 64>}, {pipeline_mode = #tpu.pipeline_mode<synchronous>, transform_indices = @transform_5, window_bounds = array<i64: 1, 64>}, {transform_indices = @transform_6, window_bounds = array<i64: 1, 1, 10>}, {pipeline_mode = #tpu.pipeline_mode<synchronous>, transform_indices = @transform_7, window_bounds = array<i64: 10, 256>}, {pipeline_mode = #tpu.pipeline_mode<synchronous>, transform_indices = @transform_8, window_bounds = array<i64: 1, 256>}, {pipeline_mode = #tpu.pipeline_mode<synchronous>, transform_indices = @transform_9, window_bounds = array<i64: 256, 1024>}, {pipeline_mode = #tpu.pipeline_mode<synchronous>, transform_indices = @transform_10, window_bounds = array<i64: 1, 1024>}, {pipeline_mode = #tpu.pipeline_mode<synchronous>, transform_indices = @transform_11, window_bounds = array<i64: 1024, 64>}, {pipeline_mode = #tpu.pipeline_mode<synchronous>, transform_indices = @transform_12, window_bounds = array<i64: 1, 64>}, {transform_indices = @transform_13, window_bounds = array<i64: 1, 32, 64>}]} {
    %c0 = arith.constant 0 : index
    %c0_0 = arith.constant 0 : index
    %c0_1 = arith.constant 0 : index
    %0 = vector.load %arg1[%c0, %c0_0, %c0_1] : memref<1x16x192xbf16, #tpu.memory_space<vmem>>, vector<1x16x192xbf16>
    %1 = vector.shape_cast %0 : vector<1x16x192xbf16> to vector<16x192xbf16>
    %c0_2 = arith.constant 0 : index
    %c0_3 = arith.constant 0 : index
    %2 = vector.load %arg2[%c0_2, %c0_3] : memref<192x64xbf16, #tpu.memory_space<vmem>>, vector<192x64xbf16>
    %cst = arith.constant dense<0.000000e+00> : vector<16x64xf32>
    %3 = tpu.matmul %1, %2, %cst {dimension_numbers = #tpu.dot_dimension_numbers<[1], [0], [0], [1], [0, 0, 1, 1], [], []>} : vector<16x192xbf16>, vector<192x64xbf16>, vector<16x64xf32> -> vector<16x64xf32>
    %c0_4 = arith.constant 0 : index
    %c0_5 = arith.constant 0 : index
    %4 = vector.load %arg3[%c0_4, %c0_5] : memref<1x64xf32, #tpu.memory_space<vmem>>, vector<1x64xf32>
    %5 = tpu.concatenate %4, %3 in 0 : vector<1x64xf32>, vector<16x64xf32> -> vector<17x64xf32>
    %c0_6 = arith.constant 0 : index
    %c0_7 = arith.constant 0 : index
    %6 = vector.load %arg4[%c0_6, %c0_7] : memref<17x64xf32, #tpu.memory_space<vmem>>, vector<17x64xf32>
    %7 = arith.addf %5, %6 : vector<17x64xf32>
    %c0_8 = arith.constant 0 : index
    %c0_9 = arith.constant 0 : index
    %8 = vector.load %arg5[%c0_8, %c0_9] : memref<1x64xf32, #tpu.memory_space<vmem>>, vector<1x64xf32>
    %c0_10 = arith.constant 0 : index
    %c0_11 = arith.constant 0 : index
    %9 = vector.load %arg6[%c0_10, %c0_11] : memref<1x64xf32, #tpu.memory_space<vmem>>, vector<1x64xf32>
    %cst_12 = arith.constant dense<0.000000e+00> : vector<17xf32>
    %10 = vector.multi_reduction <add>, %7, %cst_12 [1] : vector<17x64xf32> to vector<17xf32>
    %11 = vector.shape_cast %10 : vector<17xf32> to vector<17x1xf32>
    %cst_13 = arith.constant 6.400000e+01 : f32
    %12 = vector.broadcast %cst_13 : f32 to vector<17x1xf32>
    %13 = arith.divf %11, %12 : vector<17x1xf32>
    %14 = vector.broadcast %13 : vector<17x1xf32> to vector<17x64xf32>
    %15 = arith.subf %7, %14 : vector<17x64xf32>
    %16 = arith.mulf %15, %15 : vector<17x64xf32>
    %cst_14 = arith.constant dense<0.000000e+00> : vector<17xf32>
    %17 = vector.multi_reduction <add>, %16, %cst_14 [1] : vector<17x64xf32> to vector<17xf32>
    %18 = vector.shape_cast %17 : vector<17xf32> to vector<17x1xf32>
    %cst_15 = arith.constant 6.400000e+01 : f32
    %19 = vector.broadcast %cst_15 : f32 to vector<17x1xf32>
    %20 = arith.divf %18, %19 : vector<17x1xf32>
    %cst_16 = arith.constant 9.99999974E-6 : f32
    %21 = vector.broadcast %cst_16 : f32 to vector<17x1xf32>
    %22 = arith.addf %20, %21 : vector<17x1xf32>
    %23 = math.rsqrt %22 : vector<17x1xf32>
    %24 = vector.broadcast %23 : vector<17x1xf32> to vector<17x64xf32>
    %25 = arith.mulf %15, %24 : vector<17x64xf32>
    %26 = vector.broadcast %8 : vector<1x64xf32> to vector<17x64xf32>
    %27 = arith.mulf %25, %26 : vector<17x64xf32>
    %28 = vector.broadcast %9 : vector<1x64xf32> to vector<17x64xf32>
    %29 = arith.addf %27, %28 : vector<17x64xf32>
    %c0_17 = arith.constant 0 : index
    %c0_18 = arith.constant 0 : index
    %c0_19 = arith.constant 0 : index
    %30 = vector.load %arg7[%c0_17, %c0_18, %c0_19] : memref<1x1x10xbf16, #tpu.memory_space<vmem>>, vector<1x1x10xbf16>
    %31 = vector.shape_cast %30 : vector<1x1x10xbf16> to vector<1x10xbf16>
    %c0_20 = arith.constant 0 : index
    %c0_21 = arith.constant 0 : index
    %32 = vector.load %arg8[%c0_20, %c0_21] : memref<10x256xbf16, #tpu.memory_space<vmem>>, vector<10x256xbf16>
    %cst_22 = arith.constant dense<0.000000e+00> : vector<1x256xf32>
    %33 = tpu.matmul %31, %32, %cst_22 {dimension_numbers = #tpu.dot_dimension_numbers<[1], [0], [0], [1], [0, 0, 1, 1], [], []>} : vector<1x10xbf16>, vector<10x256xbf16>, vector<1x256xf32> -> vector<1x256xf32>
    %c0_23 = arith.constant 0 : index
    %c0_24 = arith.constant 0 : index
    %34 = vector.load %arg9[%c0_23, %c0_24] : memref<1x256xf32, #tpu.memory_space<vmem>>, vector<1x256xf32>
    %35 = arith.addf %33, %34 : vector<1x256xf32>
    %cst_25 = arith.constant 0.000000e+00 : f32
    %36 = vector.broadcast %cst_25 : f32 to vector<1x256xf32>
    %37 = arith.maximumf %35, %36 : vector<1x256xf32>
    %38 = arith.truncf %37 : vector<1x256xf32> to vector<1x256xbf16>
    %c0_26 = arith.constant 0 : index
    %c0_27 = arith.constant 0 : index
    %39 = vector.load %arg10[%c0_26, %c0_27] : memref<256x1024xbf16, #tpu.memory_space<vmem>>, vector<256x1024xbf16>
    %cst_28 = arith.constant dense<0.000000e+00> : vector<1x1024xf32>
    %40 = tpu.matmul %38, %39, %cst_28 {dimension_numbers = #tpu.dot_dimension_numbers<[1], [0], [0], [1], [0, 0, 1, 1], [], []>} : vector<1x256xbf16>, vector<256x1024xbf16>, vector<1x1024xf32> -> vector<1x1024xf32>
    %c0_29 = arith.constant 0 : index
    %c0_30 = arith.constant 0 : index
    %41 = vector.load %arg11[%c0_29, %c0_30] : memref<1x1024xf32, #tpu.memory_space<vmem>>, vector<1x1024xf32>
    %42 = arith.addf %40, %41 : vector<1x1024xf32>
    %cst_31 = arith.constant 0.000000e+00 : f32
    %43 = vector.broadcast %cst_31 : f32 to vector<1x1024xf32>
    %44 = arith.maximumf %42, %43 : vector<1x1024xf32>
    %45 = arith.truncf %44 : vector<1x1024xf32> to vector<1x1024xbf16>
    %c0_32 = arith.constant 0 : index
    %c0_33 = arith.constant 0 : index
    %46 = vector.load %arg12[%c0_32, %c0_33] : memref<1024x64xbf16, #tpu.memory_space<vmem>>, vector<1024x64xbf16>
    %cst_34 = arith.constant dense<0.000000e+00> : vector<1x64xf32>
    %47 = tpu.matmul %45, %46, %cst_34 {dimension_numbers = #tpu.dot_dimension_numbers<[1], [0], [0], [1], [0, 0, 1, 1], [], []>} : vector<1x1024xbf16>, vector<1024x64xbf16>, vector<1x64xf32> -> vector<1x64xf32>
    %c0_35 = arith.constant 0 : index
    %c0_36 = arith.constant 0 : index
    %48 = vector.load %arg13[%c0_35, %c0_36] : memref<1x64xf32, #tpu.memory_space<vmem>>, vector<1x64xf32>
    %49 = arith.addf %47, %48 : vector<1x64xf32>
    %cst_37 = arith.constant 0.000000e+00 : f32
    %50 = vector.broadcast %cst_37 : f32 to vector<14x64xf32>
    %51 = tpu.concatenate %29, %49, %50 in 0 : vector<17x64xf32>, vector<1x64xf32>, vector<14x64xf32> -> vector<32x64xf32>
    %c0_38 = arith.constant 0 : index
    %c0_39 = arith.constant 0 : index
    %c0_40 = arith.constant 0 : index
    %52 = vector.load %arg14[%c0_38, %c0_39, %c0_40] : memref<1x32x64xf32, #tpu.memory_space<vmem>>, vector<1x32x64xf32>
    %53 = vector.shape_cast %52 : vector<1x32x64xf32> to vector<32x64xf32>
    %54 = vector.shape_cast %51 : vector<32x64xf32> to vector<1x32x64xf32>
    tpu.vector_store %arg14[%c0_38, %c0_39, %c0_40], %54 {strides = array<i32>} : memref<1x32x64xf32, #tpu.memory_space<vmem>>, vector<1x32x64xf32>,
    return
  }
  func.func @transform_0(%arg0: i32) -> (i32, i32, i32) {
    %c0_i32 = arith.constant 0 : i32
    %c0_i32_0 = arith.constant 0 : i32
    %c0_i32_1 = arith.constant 0 : i32
    return %arg0, %c0_i32, %c0_i32_0 : i32, i32, i32
  }
  func.func @transform_1(%arg0: i32) -> (i32, i32) {
    %c0_i32 = arith.constant 0 : i32
    %c0_i32_0 = arith.constant 0 : i32
    %c0_i32_1 = arith.constant 0 : i32
    return %c0_i32, %c0_i32_0 : i32, i32
  }
  func.func @transform_2(%arg0: i32) -> (i32, i32) {
    %c0_i32 = arith.constant 0 : i32
    %c0_i32_0 = arith.constant 0 : i32
    %c0_i32_1 = arith.constant 0 : i32
    return %c0_i32, %c0_i32_0 : i32, i32
  }
  func.func @transform_3(%arg0: i32) -> (i32, i32) {
    %c0_i32 = arith.constant 0 : i32
    %c0_i32_0 = arith.constant 0 : i32
    %c0_i32_1 = arith.constant 0 : i32
    return %c0_i32, %c0_i32_0 : i32, i32
  }
  func.func @transform_4(%arg0: i32) -> (i32, i32) {
    %c0_i32 = arith.constant 0 : i32
    %c0_i32_0 = arith.constant 0 : i32
    %c0_i32_1 = arith.constant 0 : i32
    return %c0_i32, %c0_i32_0 : i32, i32
  }
  func.func @transform_5(%arg0: i32) -> (i32, i32) {
    %c0_i32 = arith.constant 0 : i32
    %c0_i32_0 = arith.constant 0 : i32
    %c0_i32_1 = arith.constant 0 : i32
    return %c0_i32, %c0_i32_0 : i32, i32
  }
  func.func @transform_6(%arg0: i32) -> (i32, i32, i32) {
    %c0_i32 = arith.constant 0 : i32
    %c0_i32_0 = arith.constant 0 : i32
    %c0_i32_1 = arith.constant 0 : i32
    return %arg0, %c0_i32, %c0_i32_0 : i32, i32, i32
  }
  func.func @transform_7(%arg0: i32) -> (i32, i32) {
    %c0_i32 = arith.constant 0 : i32
    %c0_i32_0 = arith.constant 0 : i32
    %c0_i32_1 = arith.constant 0 : i32
    return %c0_i32, %c0_i32_0 : i32, i32
  }
  func.func @transform_8(%arg0: i32) -> (i32, i32) {
    %c0_i32 = arith.constant 0 : i32
    %c0_i32_0 = arith.constant 0 : i32
    %c0_i32_1 = arith.constant 0 : i32
    return %c0_i32, %c0_i32_0 : i32, i32
  }
  func.func @transform_9(%arg0: i32) -> (i32, i32) {
    %c0_i32 = arith.constant 0 : i32
    %c0_i32_0 = arith.constant 0 : i32
    %c0_i32_1 = arith.constant 0 : i32
    return %c0_i32, %c0_i32_0 : i32, i32
  }
  func.func @transform_10(%arg0: i32) -> (i32, i32) {
    %c0_i32 = arith.constant 0 : i32
    %c0_i32_0 = arith.constant 0 : i32
    %c0_i32_1 = arith.constant 0 : i32
    return %c0_i32, %c0_i32_0 : i32, i32
  }
  func.func @transform_11(%arg0: i32) -> (i32, i32) {
    %c0_i32 = arith.constant 0 : i32
    %c0_i32_0 = arith.constant 0 : i32
    %c0_i32_1 = arith.constant 0 : i32
    return %c0_i32, %c0_i32_0 : i32, i32
  }
  func.func @transform_12(%arg0: i32) -> (i32, i32) {
    %c0_i32 = arith.constant 0 : i32
    %c0_i32_0 = arith.constant 0 : i32
    %c0_i32_1 = arith.constant 0 : i32
    return %c0_i32, %c0_i32_0 : i32, i32
  }
  func.func @transform_13(%arg0: i32) -> (i32, i32, i32) {
    %c0_i32 = arith.constant 0 : i32
    %c0_i32_0 = arith.constant 0 : i32
    %c0_i32_1 = arith.constant 0 : i32
    return %arg0, %c0_i32, %c0_i32_0 : i32, i32, i32
  }
}

</mosaic_0001>

<bundles_post_ra>
// kernel: tpu_custom_call.1
= control target key start
LH: loop header
LB: loop body
LE: loop exit
PB: predicated region body
PF: predicated region fallthrough
CT: control target
= control target key end

     0   :  { %18 = vsyncpa [#allocation3], 0  ;;  %s3707_s0 = inlined_call_operand.vmem [shape: bf16[2,16,192], index: 0, kind: input, shape index: {}]   ;;  %s3708_s1 = inlined_call_operand.vmem [shape: bf16[192,64], index: 1, kind: input, shape index: {}]   ;;  %s3709_s2 = inlined_call_operand.vmem [shape: f32[1,64], index: 2, kind: input, shape index: {}]   ;;  %s3710_s3 = inlined_call_operand.vmem [shape: f32[17,64], index: 3, kind: input, shape index: {}]   ;;  %s3711_s4 = inlined_call_operand.vmem [shape: f32[1,64], index: 4, kind: input, shape index: {}]   ;;  %s3712_s5 = inlined_call_operand.vmem [shape: f32[1,64], index: 5, kind: input, shape index: {}]   ;;  %s3713_s6 = inlined_call_operand.vmem [shape: bf16[2,1,10], index: 6, kind: input, shape index: {}]   ;;  %s3714_s7 = inlined_call_operand.vmem [shape: bf16[10,256], index: 7, kind: input, shape index: {}]   ;;  %s3715_s8 = inlined_call_operand.vmem [shape: f32[1,256], index: 8, kind: input, shape index: {}]   ;;  %s3716_s9 = inlined_call_operand.hbm [shape: bf16[256,1024], index: 9, kind: input, shape index: {}]   ;;  %s3717_s10 = inlined_call_operand.vmem [shape: f32[1,1024], index: 10, kind: input, shape index: {}]   ;;  %s3718_s11 = inlined_call_operand.vmem [shape: bf16[1024,64], index: 11, kind: input, shape index: {}]   ;;  %s3719_s12 = inlined_call_operand.vmem [shape: f32[1,64], index: 12, kind: input, shape index: {}]   ;;  %s3720_s13 = inlined_call_operand.hbm [shape: f32[2,32,64], index: 13, kind: output, shape index: {}]  }
   0x1   :  { %19 = vsyncpa [#allocation4], 0 }
   0x2   :  { %21 = vsyncpa [#allocation4 + $0x1], 0  ;;  %s3183_s25 = smov 0   ;;  %s3185_s26 = smov 0  }
   0x3   :  { %s3187_s27 = smov 0   ;;  %s3189_s28 = smov 0  }
   0x4 LB: > { %3727 = sst [smem:[#allocation8_spill]] %s3099_s27  ;;  %s3204_s29 = sadd.s32 4294967295, %s3103_s28   ;;  %s3103_s28 = sphi %s3189_s28, %s3739_s28   ;;  %s3099_s27 = sphi %s3187_s27, %s3741_s27   ;;  %s3095_s26 = sphi %s3185_s26, %s3743_s26   ;;  %s3091_s25 = sphi %s3183_s25, %s3742_s25  }
   0x5   : > { %s2548_s30 = sadd.s32 4294967294, %s3103_s28   ;;  %s3208_s14 = sadd.s32 1, %s3103_s28  }
   0x6   : > { %3728 = sst [smem:[#allocation9_spill]] %s3208_s14  ;;  %s317_s15 = sadd.s32 1, %s3099_s27 }
   0x7   : > { %s314_s16 = ssub.s32 %s3103_s28, %s3208_s14  ;;  %p327_p0 = scmp.ne.s32.totalorder %s3099_s27, %s3095_s26 }
   0x8   : > { %p315_p1 = scmp.eq.s32.totalorder %s314_s16, 0  ;;  %p328_p2 = scmp.eq.s32.totalorder %s3204_s29, 1 }
   0x9   : > { %p333_p3 = scmp.ne.s32.totalorder %s3095_s26, %s3091_s25  ;;  %p334_p4 = scmp.eq.s32.totalorder %s2548_s30, 1 }
   0xa   : > { %s3219_s17 = scalar_select %p315_p1, %s3099_s27, %s317_s15  }
   0xb   : > { %p3221_p5 = por %p328_p2, %p327_p0  ;;  %p3225_p6 = por %p334_p4, %p333_p3 }
   0xc   : > { %3729 = sst [smem:[#allocation10_spill]] %s3219_s17  ;;  %p2549_p7 = scmp.ge.s32.totalorder %s3103_s28, 1 }
   0xd   : > { %s3730_s18 = scalar_select %p3221_p5, 1, 0 }
   0xe   : > { %s3731_s19 = scalar_select %p3225_p6, 1, 0 }
   0xf   : > { %p341_p8 = scmp.lt.s32.totalorder %s3103_s28, 3  ;;  %p3724_p9 = scmp.eq.s32.totalorder %s3204_s29, 0 }
  0x10   : > { %s3105_s21 = smov [#allocation2]   ;;  %s3009_s15 = scalar_lea.hbm %s3716_s9, 16384 }
  0x11   : > { %p3232_p10 = pnand %p2549_p7, %p341_p8  ;;  %s374_s22 = sshll.u32 %s3105_s21, 4  ;;  %s375_s22 = int_to_ptr.vmem [resolvable:$true] %s374_s22 }
  0x12   : > { %p3010_p13 = scmp.ne.s32.totalorder %s3716_s9, %s3009_s15  ;;  %p3016_p3 = scmp.lt.u32.totalorder %s3009_s15, %s3716_s9 }
  0x13   : > { %s3732_s20 = scalar_select %p3232_p10, 1, 0 }
  0x14   : > { %p2871_p11 = pneg %p3232_p10 }
  0x16   : > { %p3240_p12 = pnand %p3724_p9, %p2871_p11 }
  0x18   : > { %p3011_p0 = pneg %p3240_p12 }
  0x1a   : > { %p3012_p1 = pnand %p3011_p0, %p3010_p13 }
  0x1c   : > { %p3013_p2 = pneg %p3012_p1 }
  0x1e   : > { %p3018_p4 = pnand %p3016_p3, %p3013_p2 }
  0x20   : > { %3021 = shalt.err (!%p3018_p4)
}
  0x21   : > { %s3022_s14 = scalar_lea.vmem %s375_s22, 16384  ;;  %p3030_p9 = scmp.lt.s32.totalorder %s375_s22, %s375_s22 }
  0x22   : > { %p3023_p7 = scmp.ne.s32.totalorder %s375_s22, %s3022_s14  ;;  %p3031_p6 = scmp.lt.s32.totalorder %s3022_s14, %s3022_s14 }
  0x24   : > { %p3025_p8 = pnand %p3023_p7, %p3011_p0  ;;  %p3032_p5 = por %p3031_p6, %p3030_p9 }
  0x26   : > { %p3026_p11 = pneg %p3025_p8 }
  0x28   : > { %p3033_p10 = pnand %p3032_p5, %p3026_p11 }
  0x2a   : > { %3036 = shalt.err (!%p3033_p10)
}
  0x2b   : > { %s3106_s17 = smov 512   ;;  %s3107_s24 = smov 32  }
  0x2c   : > { %2874 = dma.hbm_to_vmem [thread:$0]  (!%p3240_p12), %s3716_s9, 16384, %s375_s22, [#allocation3], %s3106_s17, %s3106_s17, %s3107_s24  }
  0x2d   : > { %p3734_p13 = scmp.ne.s32.totalorder %s3732_s20, 0 }
  0x2e   : > { %p3735_p1 = scmp.eq.s32.totalorder (!%p3734_p13), %s3204_s29, 0 }
  0x2f   : > { %413 = sbr.rel (%p3734_p13) target bundleno = 854 (0x356), region = 72 }
  0x36   : > { %3082 = dma.done.wait (%p3735_p1), [#allocation3], 16384   ;;  %p3736_p0 = pmov %p3735_p1 }
  0x37   : > { %v3108_v0 = vmov 0   ;;  %p460_p5 = scmp.lt.s32.totalorder %s3204_s29, 1  ;;  %v2921_v1 = vld [vmem:[%s3708_s1] sm:$0xff]   ;;  %v2922_v2 = vld [vmem:[%s3708_s1 + $0x8] sm:$0xff]   ;;  %v2923_v3 = vld [vmem:[%s3708_s1 + $0x10] sm:$0xff]   ;;  %vm576_vm0 = vcmask 523264  }
  0x38   : > { %3084 = vsyncadd (%p3736_p0), [#allocation3], 4294950912  ;;  %580 = vmatprep.subr.bf16.mxu0 %v3108_v0  ;;  %v2924_v4 = vld [vmem:[%s3708_s1 + $0x18] sm:$0xff]   ;;  %v2925_v6 = vld [vmem:[%s3708_s1 + $0x20] sm:$0xff]   ;;  %vm726_vm1 = vcmask 1044480   ;;  %vm722_vm2 = vcmask 80896  }
  0x39   : > { %581 = vmatpush1.bf16.msra.mxu0 %v2921_v1  ;;  %s3276_s23 = scalar_select %p460_p5, %s3204_s29, 1  ;;  %v778_v7 = vld [vmem:[#allocation2] sm:$0xff]  ;;  %v2926_v13 = vld [vmem:[%s3708_s1 + $0x28] sm:$0xff]   ;;  %v2927_v21 = vld [vmem:[%s3708_s1 + $0x30] sm:$0xff]   ;;  %vm624_vm3 = vcmask 1040384   ;;  %vm646_vm4 = vcmask 516096  }
  0x3a   : > { %582 = vmatprep.subr.bf16.mxu0 %v3108_v0  ;;  %v782_v8 = vld [vmem:[#allocation2 + $0x20] sm:$0xff]  ;;  %v2928_v26 = vld [vmem:[%s3708_s1 + $0x38] sm:$0xff]   ;;  %v2930_v37 = vld [vmem:[%s3708_s1 + $0x48] sm:$0xff]   ;;  %s2776_s22 = sshll.u32 %s3204_s29, 9  ;;  %vm2445_vm5 = vcmask 1041408   ;;  %p3737_p9 = scmp.ne.s32.totalorder %s3730_s18, 0 }
  0x3b   : > { %s2775_s17 = sshll.u32 %s3276_s23, 4  ;;  %v2579_v9 = vcombine.high %v778_v7, %v782_v8  ;;  %v2578_v10 = vcombine.low %v778_v7, %v782_v8  ;;  %v786_v11 = vld [vmem:[#allocation2 + $0x40] sm:$0xff]  ;;  %v2931_v42 = vld [vmem:[%s3708_s1 + $0x50] sm:$0xff]   ;;  %v2932_v47 = vld [vmem:[%s3708_s1 + $0x58] sm:$0xff]   ;;  %s467_s21 = scalar_lea.vmem %s3713_s6, %s3276_s23 }
  0x3c   : > { %s3289_s14 = scalar_lea.vmem %s3707_s0, %s2775_s17  ;;  %v790_v12 = vld [vmem:[#allocation2 + $0x60] sm:$0xff]  ;;  %v779_v50 = vld [vmem:[#allocation2 + $0x8] sm:$0xff]  ;;  %s3657_s23 = scalar_lea.hbm %s3720_s13, %s2776_s22 }
  0x3d   : > { %583 = vmatpush1.bf16.msra.mxu0 %v2922_v2  ;;  %v2935_v5 = vld [vmem:[%s3289_s14 + $0x4] ss:$8 sps:$4 sm:$0xff]   ;;  %1588 = vmatprep.subr.bf16.mxu1 %v2579_v9  ;;  %v2587_v14 = vcombine.high %v786_v11, %v790_v12  ;;  %v2586_v17 = vcombine.low %v786_v11, %v790_v12  ;;  %v2938_v27 = vld [vmem:[%s3714_s7] ss:$8 sps:$4 sm:$0x1f]  }
  0x3e   : > { %584 = vmatprep.subr.bf16.mxu0 %v3108_v0  ;;  %2571 = vmatprep.mubr.msk.bf16.mxu0 %vm576_vm0, %v2935_v5  ;;  %v794_v15 = vld [vmem:[#allocation2 + $0x80] sm:$0xff]  ;;  %v728_v33 = vsel %vm726_vm1, %v2938_v27, 0  ;;  %v783_v51 = vld [vmem:[#allocation2 + $0x28] sm:$0xff] }
  0x3f   : > { %v798_v16 = vld [vmem:[#allocation2 + $0xa0] sm:$0xff]  ;;  %1589 = vmatpush1.bf16.msra.mxu1 %v2578_v10  ;;  %v2581_v57 = vcombine.high %v779_v50, %v783_v51  ;;  %v787_v62 = vld [vmem:[#allocation2 + $0x48] sm:$0xff] }
  0x40   : > { %1590 = vmatprep.subr.bf16.mxu1 %v2587_v14  ;;  %v2595_v18 = vcombine.high %v794_v15, %v798_v16  ;;  %v802_v19 = vld [vmem:[#allocation2 + $0xc0] sm:$0xff]  ;;  %v2594_v22 = vcombine.low %v794_v15, %v798_v16  ;;  %v791_v63 = vld [vmem:[#allocation2 + $0x68] sm:$0xff] }
  0x41   : > { %585 = vmatpush1.bf16.msra.mxu0 %v2923_v3  ;;  %v806_v20 = vld [vmem:[#allocation2 + $0xe0] sm:$0xff]  ;;  %v795_v7 = vld [vmem:[#allocation2 + $0x88] sm:$0xff]  ;;  %v2589_v9 = vcombine.high %v787_v62, %v791_v63 }
  0x42   : > { %586 = vmatprep.subr.bf16.mxu0 %v3108_v0  ;;  %v2603_v23 = vcombine.high %v802_v19, %v806_v20  ;;  %v810_v24 = vld [vmem:[#allocation2 + $0x100] sm:$0xff]  ;;  %v2602_v28 = vcombine.low %v802_v19, %v806_v20  ;;  %v799_v8 = vld [vmem:[#allocation2 + $0xa8] sm:$0xff] }
  0x43   : > { %1591 = vmatpush1.bf16.msra.mxu1 %v2586_v17  ;;  %v814_v25 = vld [vmem:[#allocation2 + $0x120] sm:$0xff]  ;;  %v803_v12 = vld [vmem:[#allocation2 + $0xc8] sm:$0xff]  ;;  %v2597_v14 = vcombine.high %v795_v7, %v799_v8  ;;  %v2596_v16 = vcombine.low %v795_v7, %v799_v8 }
  0x44   : > { %1592 = vmatprep.subr.bf16.mxu1 %v2595_v18  ;;  %v2611_v29 = vcombine.high %v810_v24, %v814_v25  ;;  %v818_v30 = vld [vmem:[#allocation2 + $0x140] sm:$0xff]  ;;  %v2610_v34 = vcombine.low %v810_v24, %v814_v25  ;;  %v811_v17 = vld [vmem:[#allocation2 + $0x108] sm:$0xff] }
  0x45   : > { %587 = vmatpush1.bf16.msra.mxu0 %v2924_v4  ;;  %v822_v31 = vld [vmem:[#allocation2 + $0x160] sm:$0xff]  ;;  %v815_v18 = vld [vmem:[#allocation2 + $0x128] sm:$0xff] }
  0x46   : > { %588 = vmatprep.subr.bf16.mxu0 %v3108_v0  ;;  %v2929_v32 = vld [vmem:[%s3708_s1 + $0x40] sm:$0xff]   ;;  %v2619_v38 = vcombine.high %v818_v30, %v822_v31  ;;  %v2618_v39 = vcombine.low %v818_v30, %v822_v31  ;;  %v2612_v24 = vcombine.low %v811_v17, %v815_v18  ;;  %v827_v25 = vld [vmem:[#allocation2 + $0x188] sm:$0xff] }
  0x47   : > { %1593 = vmatpush1.bf16.msra.mxu1 %v2594_v22  ;;  %v826_v35 = vld [vmem:[#allocation2 + $0x180] sm:$0xff]  ;;  %v823_v22 = vld [vmem:[#allocation2 + $0x168] sm:$0xff] }
  0x48   : > { %1594 = vmatprep.subr.bf16.mxu1 %v2603_v23  ;;  %v830_v36 = vld [vmem:[#allocation2 + $0x1a0] sm:$0xff]  ;;  %v2613_v23 = vcombine.high %v811_v17, %v815_v18  ;;  %v835_v30 = vld [vmem:[#allocation2 + $0x1c8] sm:$0xff] }
  0x49   : > { %589 = vmatpush1.bf16.msra.mxu0 %v2925_v6  ;;  %v834_v40 = vld [vmem:[#allocation2 + $0x1c0] sm:$0xff]  ;;  %v2627_v43 = vcombine.high %v826_v35, %v830_v36  ;;  %v2626_v44 = vcombine.low %v826_v35, %v830_v36  ;;  %v2580_v6 = vcombine.low %v779_v50, %v783_v51  ;;  %v839_v31 = vld [vmem:[#allocation2 + $0x1e8] sm:$0xff] }
  0x4a   : > { %590 = vmatprep.subr.bf16.mxu0 %v3108_v0  ;;  %v838_v41 = vld [vmem:[#allocation2 + $0x1e0] sm:$0xff]  ;;  %v847_v35 = vld [vmem:[#allocation2 + $0x228] sm:$0xff]  ;;  %v2636_v36 = vcombine.low %v835_v30, %v839_v31 }
  0x4b   : > { %1595 = vmatpush1.bf16.msra.mxu1 %v2602_v28  ;;  %v842_v45 = vld [vmem:[#allocation2 + $0x200] sm:$0xff]  ;;  %v2635_v48 = vcombine.high %v834_v40, %v838_v41  ;;  %v2634_v53 = vcombine.low %v834_v40, %v838_v41  ;;  %v895_v8 = vld [vmem:[#allocation2 + $0x3a8] sm:$0xff] }
  0x4c   : > { %1596 = vmatprep.subr.bf16.mxu1 %v2611_v29  ;;  %v846_v46 = vld [vmem:[#allocation2 + $0x220] sm:$0xff] }
  0x4d   : > { %591 = vmatpush1.bf16.msra.mxu0 %v2926_v13  ;;  %v2936_v49 = vld [vmem:[%s3714_s7 + $0x4] ss:$8 sps:$4 sm:$0x1f]   ;;  %v2933_v52 = vld [vmem:[%s3289_s14] ss:$8 sps:$4 sm:$0xff]   ;;  %v2643_v56 = vcombine.high %v842_v45, %v846_v46  ;;  %v2642_v58 = vcombine.low %v842_v45, %v846_v46 }
  0x4e   : > { %592 = vmatprep.subr.bf16.mxu0 %v3108_v0  ;;  %v850_v54 = vld [vmem:[#allocation2 + $0x240] sm:$0xff]  ;;  %v807_v13 = vld [vmem:[#allocation2 + $0xe8] sm:$0xff] }
  0x4f   : > { %1597 = vmatpush1.bf16.msra.mxu1 %v2610_v34  ;;  %v854_v55 = vld [vmem:[#allocation2 + $0x260] sm:$0xff]  ;;  %v2605_v19 = vcombine.high %v803_v12, %v807_v13  ;;  %v2604_v20 = vcombine.low %v803_v12, %v807_v13  ;;  %v843_v34 = vld [vmem:[#allocation2 + $0x208] sm:$0xff] }
  0x50   : > { %1598 = vmatprep.subr.bf16.mxu1 %v2619_v38  ;;  %v858_v59 = vld [vmem:[#allocation2 + $0x280] sm:$0xff]  ;;  %v2651_v61 = vcombine.high %v850_v54, %v854_v55  ;;  %v2650_v1 = vcombine.low %v850_v54, %v854_v55  ;;  %v851_v38 = vld [vmem:[#allocation2 + $0x248] sm:$0xff]  ;;  %v2644_v40 = vcombine.low %v843_v34, %v847_v35 }
  0x51   : > { %593 = vmatpush1.bf16.msra.mxu0 %v2927_v21  ;;  %v862_v60 = vld [vmem:[#allocation2 + $0x2a0] sm:$0xff]  ;;  %v819_v21 = vld [vmem:[#allocation2 + $0x148] sm:$0xff] }
  0x52   : > { %594 = vmatprep.subr.bf16.mxu0 %v3108_v0  ;;  %v866_v2 = vld [vmem:[#allocation2 + $0x2c0] sm:$0xff]  ;;  %v2659_v5 = vcombine.high %v858_v59, %v862_v60  ;;  %v2658_v10 = vcombine.low %v858_v59, %v862_v60  ;;  %v2621_v27 = vcombine.high %v819_v21, %v823_v22  ;;  %v2620_v28 = vcombine.low %v819_v21, %v823_v22  ;;  %v867_v46 = vld [vmem:[#allocation2 + $0x2c8] sm:$0xff]  ;;  %v3345_v21 = vld [vmem:[#allocation2 + $0x18] sm:$0xff] }
  0x53   : > { %1599 = vmatpush1.bf16.msra.mxu1 %v2618_v39  ;;  %v870_v3 = vld [vmem:[#allocation2 + $0x2e0] sm:$0xff]  ;;  %v855_v39 = vld [vmem:[#allocation2 + $0x268] sm:$0xff] }
  0x54   : > { %1600 = vmatprep.subr.bf16.mxu1 %v2627_v43  ;;  %v699_v4 = vld [vmem:[%s467_s21] sm:$0x1]  ;;  %v2667_v11 = vcombine.high %v866_v2, %v870_v3  ;;  %v2666_v15 = vcombine.low %v866_v2, %v870_v3  ;;  %v2653_v41 = vcombine.high %v851_v38, %v855_v39  ;;  %v863_v43 = vld [vmem:[#allocation2 + $0x2a8] sm:$0xff]  ;;  %s457_s21 = sand.u32 1, %s3095_s26  }
  0x55   : > { %595 = vmatpush1.bf16.msra.mxu0 %v2928_v26  ;;  %v831_v26 = vld [vmem:[#allocation2 + $0x1a8] sm:$0xff]  ;;  %v874_v51 = vld [vmem:[#allocation2 + $0x300] sm:$0xff]  ;;  %s2554_s24 = sshll.u32 %s457_s21, 5  ;;  %s3666_s29 = scalar_lea.sflag [#allocation4], %s457_s21 }
  0x56   : > { %596 = vmatprep.subr.bf16.mxu0 %v3108_v0  ;;  %v2629_v29 = vcombine.high %v827_v25, %v831_v26  ;;  %v879_v55 = vld [vmem:[#allocation2 + $0x328] sm:$0xff]  ;;  %v882_v59 = vld [vmem:[#allocation2 + $0x340] sm:$0xff]  ;;  %s3641_s30 = scalar_lea.vmem [#allocation5], %s2554_s24  ;;  %s3110_s24 = smov [#allocation5]  }
  0x57   : > { %1601 = vmatpush1.bf16.msra.mxu1 %v2626_v44  ;;  %v2652_v44 = vcombine.low %v851_v38, %v855_v39  ;;  %v886_v60 = vld [vmem:[#allocation2 + $0x360] sm:$0xff]  ;;  %v899_v13 = vld [vmem:[#allocation2 + $0x3c8] sm:$0xff]  ;;  %s2465_s20 = sshll.u32 %s3641_s30, 4  ;;  %s3041_s16 = sshll.u32 %s3110_s24, 4  ;;  %s3659_s20 = int_to_ptr.vmem [resolvable:$true] %s2465_s20  ;;  %s3042_s16 = int_to_ptr.vmem [resolvable:$false] %s3041_s16 }
  0x58   : > { %1602 = vmatprep.subr.bf16.mxu1 %v2635_v48  ;;  %v2682_v3 = vcombine.low %v882_v59, %v886_v60  ;;  %v902_v12 = vld [vmem:[#allocation2 + $0x3e0] sm:$0xff]  ;;  %s3037_s17 = scalar_lea.vmem %s3659_s20, 512  ;;  %s3043_s27 = scalar_lea.vmem %s3042_s16, 1024 }
  0x59   : > { %597 = vmatpush1.bf16.msra.mxu0 %v2929_v32  ;;  %v2628_v32 = vcombine.low %v827_v25, %v831_v26  ;;  %p3038_p6 = scmp.ne.s32.totalorder %s3659_s20, %s3037_s17  ;;  %p3044_p2 = scmp.lt.s32.totalorder %s3659_s20, %s3042_s16 }
  0x5a   : > { %598 = vmatprep.subr.bf16.mxu0 %v3108_v0  ;;  %p3045_p3 = scmp.lt.s32.totalorder %s3043_s27, %s3037_s17 }
  0x5b   : > { %1603 = vmatpush1.bf16.msra.mxu1 %v2634_v53  ;;  %v875_v53 = vld [vmem:[#allocation2 + $0x308] sm:$0xff]  ;;  %p3039_p10 = pnand %p3038_p6, %p3737_p9 }
  0x5c   : > { %1604 = vmatprep.subr.bf16.mxu1 %v2643_v56  ;;  %v2676_v56 = vcombine.low %v875_v53, %v879_v55  ;;  %p3046_p4 = por %p3045_p3, %p3044_p2 }
  0x5d   : > { %599 = vmatpush1.bf16.msra.mxu0 %v2930_v37  ;;  %v2645_v37 = vcombine.high %v843_v34, %v847_v35  ;;  %v634_v35 = vld [vmem:[%s3710_s3 + $0x10] sm:$0x1]  ;;  %p3040_p12 = pneg %p3039_p10 }
  0x5e   : > { %600 = vmatprep.subr.bf16.mxu0 %v3108_v0 }
  0x5f   : > { %1605 = vmatpush1.bf16.msra.mxu1 %v2642_v58  ;;  %p3047_p7 = pnand %p3046_p4, %p3040_p12 }
  0x60   : > { %1606 = vmatprep.subr.bf16.mxu1 %v2651_v61  ;;  %v883_v61 = vld [vmem:[#allocation2 + $0x348] sm:$0xff] }
  0x61   : > { %601 = vmatpush1.bf16.msra.mxu0 %v2931_v42  ;;  %v859_v42 = vld [vmem:[#allocation2 + $0x288] sm:$0xff] }
  0x62   : > { %602 = vmatprep.subr.bf16.mxu0 %v3108_v0  ;;  %v2661_v45 = vcombine.high %v859_v42, %v863_v43  ;;  %v2660_v48 = vcombine.low %v859_v42, %v863_v43  ;;  %v632_v42 = vld [vmem:[%s3710_s3] sm:$0xff] }
  0x63   : > { %1607 = vmatpush1.bf16.msra.mxu1 %v2650_v1 }
  0x64   : > { %1608 = vmatprep.subr.bf16.mxu1 %v2659_v5  ;;  %v894_v5 = vld [vmem:[#allocation2 + $0x3a0] sm:$0xff] }
  0x65   : > { %603 = vmatpush1.bf16.msra.mxu0 %v2932_v47  ;;  %v871_v47 = vld [vmem:[#allocation2 + $0x2e8] sm:$0xff] }
  0x66   : > { %2576 = vmatprep.subr.msk.bf16.mxu0 %vm726_vm1, %v2936_v49  ;;  %v2669_v49 = vcombine.high %v867_v46, %v871_v47  ;;  %v2668_v50 = vcombine.low %v867_v46, %v871_v47 }
  0x67   : > { %1609 = vmatpush1.bf16.msra.mxu1 %v2658_v10 }
  0x68   : > { %613 = vmatmul.mubr.bf16.vlgmr.msra.gmra.mrb[0].mxu0 %v2933_v52  ;;  %1610 = vmatprep.subr.bf16.mxu1 %v2667_v11  ;;  %v878_v52 = vld [vmem:[#allocation2 + $0x320] sm:$0xff] }
  0x69   : > { %734 = vmatpush1.bf16.msra.mxu0 %v728_v33  ;;  %765 = vmatprep.mubr.bf16.mxu0 %v3108_v0  ;;  %v2588_v0 = vcombine.low %v787_v62, %v791_v63  ;;  %v2637_v33 = vcombine.high %v835_v30, %v839_v31  ;;  %v2675_v54 = vcombine.high %v874_v51, %v878_v52  ;;  %v887_v63 = vld [vmem:[#allocation2 + $0x368] sm:$0xff] }
  0x6a   : > { %1629 = vmatprep.subr.bf16.mxu0 %v2581_v57  ;;  %v2677_v57 = vcombine.high %v875_v53, %v879_v55  ;;  %v2674_v58 = vcombine.low %v874_v51, %v878_v52  ;;  %v2683_v62 = vcombine.high %v882_v59, %v886_v60  ;;  %v2684_v1 = vcombine.low %v883_v61, %v887_v63  ;;  %v788_v60 = vld [vmem:[#allocation2 + $0x50] sm:$0xff] }
  0x6b   : > { %1611 = vmatpush1.bf16.msra.mxu1 %v2666_v15  ;;  %v2685_v2 = vcombine.high %v883_v61, %v887_v63  ;;  %v903_v15 = vld [vmem:[#allocation2 + $0x3e8] sm:$0xff]  ;;  %v792_v61 = vld [vmem:[#allocation2 + $0x70] sm:$0xff]  ;;  %v793_v63 = vld [vmem:[#allocation2 + $0x78] sm:$0xff] }
  0x6c   : > { %1612 = vmatprep.subr.bf16.mxu1 %v2675_v54  ;;  %v2701_v17 = vcombine.high %v899_v13, %v903_v15 }
  0x6f   : > { %1613 = vmatpush1.bf16.msra.mxu1 %v2674_v58 }
  0x70   : > { %2577 = vmatmul.mubr.msk.bf16.vlgmr.msra.gmra.mrb[4].mxu0 %vm722_vm2, %v699_v4  ;;  %v890_v4 = vld [vmem:[#allocation2 + $0x380] sm:$0xff]  ;;  %1614 = vmatprep.subr.bf16.mxu1 %v2683_v62  ;;  %v789_v62 = vld [vmem:[#allocation2 + $0x58] sm:$0xff] }
  0x71   : > { %1630 = vmatpush1.bf16.msra.mxu0 %v2580_v6  ;;  %v891_v6 = vld [vmem:[#allocation2 + $0x388] sm:$0xff]  ;;  %v2691_v7 = vcombine.high %v890_v4, %v894_v5  ;;  %v2690_v11 = vcombine.low %v890_v4, %v894_v5  ;;  %v2591_v4 = vcombine.high %v788_v60, %v792_v61  ;;  %v2593_v5 = vcombine.high %v789_v62, %v793_v63 }
  0x72   : > { %1631 = vmatprep.subr.bf16.mxu0 %v2589_v9  ;;  %v2693_v9 = vcombine.high %v891_v6, %v895_v8  ;;  %v2692_v10 = vcombine.low %v891_v6, %v895_v8  ;;  %v800_v6 = vld [vmem:[#allocation2 + $0xb0] sm:$0xff]  ;;  %v801_v8 = vld [vmem:[#allocation2 + $0xb8] sm:$0xff] }
  0x73   : > { %1615 = vmatpush1.bf16.msra.mxu1 %v2682_v3  ;;  %v796_v3 = vld [vmem:[#allocation2 + $0x90] sm:$0xff] }
  0x74   : > { %1616 = vmatprep.subr.bf16.mxu1 %v2691_v7  ;;  %v797_v7 = vld [vmem:[#allocation2 + $0x98] sm:$0xff] }
  0x75   : > { %1632 = vmatpush1.bf16.msra.mxu0 %v2588_v0  ;;  %v898_v0 = vld [vmem:[#allocation2 + $0x3c0] sm:$0xff] }
  0x76   : > { %1633 = vmatprep.subr.bf16.mxu0 %v2597_v14  ;;  %v2699_v14 = vcombine.high %v898_v0, %v902_v12  ;;  %v2698_v18 = vcombine.low %v898_v0, %v902_v12  ;;  %v2601_v0 = vcombine.high %v797_v7, %v801_v8  ;;  %v804_v12 = vld [vmem:[#allocation2 + $0xd0] sm:$0xff] }
  0x77   : > { %1617 = vmatpush1.bf16.msra.mxu1 %v2690_v11  ;;  %v2599_v11 = vcombine.high %v796_v3, %v800_v6 }
  0x78   : > { %1618 = vmatprep.subr.bf16.mxu1 %v2699_v14  ;;  %v805_v14 = vld [vmem:[#allocation2 + $0xd8] sm:$0xff] }
  0x79   : > { %1634 = vmatpush1.bf16.msra.mxu0 %v2596_v16  ;;  %v2700_v16 = vcombine.low %v899_v13, %v903_v15  ;;  %v808_v13 = vld [vmem:[#allocation2 + $0xf0] sm:$0xff]  ;;  %v809_v15 = vld [vmem:[#allocation2 + $0xf8] sm:$0xff] }
  0x7a   : > { %1635 = vmatprep.subr.bf16.mxu0 %v2605_v19  ;;  %v3341_v19 = vld [vmem:[#allocation2 + $0x10] sm:$0xff] }
  0x7b   : > { %1619 = vmatpush1.bf16.msra.mxu1 %v2698_v18  ;;  %v2607_v18 = vcombine.high %v804_v12, %v808_v13 }
  0x7d   : > { %1636 = vmatpush1.bf16.msra.mxu0 %v2604_v20  ;;  %v3343_v20 = vld [vmem:[#allocation2 + $0x30] sm:$0xff] }
  0x7e   : > { %1637 = vmatprep.subr.bf16.mxu0 %v2613_v23  ;;  %v2583_v22 = vcombine.high %v3341_v19, %v3343_v20  ;;  %v785_v23 = vld [vmem:[#allocation2 + $0x38] sm:$0xff] }
  0x7f   : > { %v2584_v25 = vcombine.low %v3345_v21, %v785_v23  ;;  %v2585_v26 = vcombine.high %v3345_v21, %v785_v23  ;;  %v816_v21 = vld [vmem:[#allocation2 + $0x130] sm:$0xff]  ;;  %v817_v23 = vld [vmem:[#allocation2 + $0x138] sm:$0xff] }
  0x80   : > { %1670 = vmatprep.subr.bf16.mxu1 %v2583_v22  ;;  %v813_v22 = vld [vmem:[#allocation2 + $0x118] sm:$0xff] }
  0x81   : > { %1638 = vmatpush1.bf16.msra.mxu0 %v2612_v24  ;;  %v2582_v24 = vcombine.low %v3341_v19, %v3343_v20  ;;  %v2609_v19 = vcombine.high %v805_v14, %v809_v15  ;;  %v812_v20 = vld [vmem:[#allocation2 + $0x110] sm:$0xff] }
  0x82   : > { %1639 = vmatprep.subr.bf16.mxu0 %v2621_v27  ;;  %v712_v27 = vlaneseq }
  0x85   : > { %1640 = vmatpush1.bf16.msra.mxu0 %v2620_v28  ;;  %v3353_v28 = vshrl.u32 %v712_v27, 7  ;;  %v2617_v27 = vcombine.high %v813_v22, %v817_v23 }
  0x86   : > { %1641 = vmatprep.subr.bf16.mxu0 %v2629_v29 }
  0x89   : > { %1642 = vmatpush1.bf16.msra.mxu0 %v2628_v32  ;;  %v714_v32 = vsub.s32 0, %v3353_v28 }
  0x8a   : > { %1643 = vmatprep.subr.bf16.mxu0 %v2637_v33  ;;  %v621_v33 = vld [vmem:[%s3709_s2] sm:$0x1] }
  0x8d   : > { %1644 = vmatpush1.bf16.msra.mxu0 %v2636_v36  ;;  %v702_v36 = vld [vmem:[%s3715_s8] sm:$0x3] }
  0x8e   : > { %1645 = vmatprep.subr.bf16.mxu0 %v2645_v37  ;;  %v718_v37 = vsub.s32 1, %v3353_v28 }
  0x90   : > { %v719_v47 = vrot.slane %v702_v36, %v718_v37 }
  0x91   : > { %1646 = vmatpush1.bf16.msra.mxu0 %v2644_v40  ;;  %v633_v40 = vld [vmem:[%s3710_s3 + $0x8] sm:$0xff] }
  0x92   : > { %1647 = vmatprep.subr.bf16.mxu0 %v2653_v41 }
  0x95   : > { %1648 = vmatpush1.bf16.msra.mxu0 %v2652_v44  ;;  %v715_v44 = vrot.slane %v702_v36, %v714_v32 }
  0x96   : > { %1649 = vmatprep.subr.bf16.mxu0 %v2661_v45 }
  0x99   : > { %1650 = vmatpush1.bf16.msra.mxu0 %v2660_v48 }
  0x9a   : > { %1651 = vmatprep.subr.bf16.mxu0 %v2669_v49 }
  0x9d   : > { %1652 = vmatpush1.bf16.msra.mxu0 %v2668_v50 }
  0x9e   : > { %1653 = vmatprep.subr.bf16.mxu0 %v2677_v57 }
  0xa1   : > { %1654 = vmatpush1.bf16.msra.mxu0 %v2676_v56 }
  0xa2   : > { %1655 = vmatprep.subr.bf16.mxu0 %v2685_v2 }
  0xa5   : > { %1656 = vmatpush1.bf16.msra.mxu0 %v2684_v1 }
  0xa6   : > { %1657 = vmatprep.subr.bf16.mxu0 %v2693_v9  ;;  %v2590_v9 = vcombine.low %v788_v60, %v792_v61  ;;  %v845_v60 = vld [vmem:[#allocation2 + $0x218] sm:$0xff] }
  0xa7   : > { %v849_v61 = vld [vmem:[#allocation2 + $0x238] sm:$0xff] }
  0xa9   : > { %1658 = vmatpush1.bf16.msra.mxu0 %v2692_v10  ;;  %v2592_v10 = vcombine.low %v789_v62, %v793_v63 }
  0xaa   : > { %1659 = vmatprep.subr.bf16.mxu0 %v2701_v17  ;;  %v2600_v17 = vcombine.low %v797_v7, %v801_v8  ;;  %v857_v7 = vld [vmem:[#allocation2 + $0x278] sm:$0xff] }
  0xad   : > { %1660 = vmatpush1.bf16.msra.mxu0 %v2700_v16  ;;  %v2598_v16 = vcombine.low %v796_v3, %v800_v6  ;;  %v2649_v3 = vcombine.high %v845_v60, %v849_v61  ;;  %v853_v6 = vld [vmem:[#allocation2 + $0x258] sm:$0xff] }
  0xae   : > { %1711 = vmatprep.subr.bf16.mxu0 %v2585_v26  ;;  %v2615_v26 = vcombine.high %v812_v20, %v816_v21 }
 0x13b   : > { %v614_v29 = vpop.f32.mrb[0].mxu0 }
 0x13c   : > { %v625_v30 = vrot.slane %v614_v29, 7  ;;  %v616_v31 = vpop.f32.mrb[1].mxu0  ;;  %v820_v29 = vld [vmem:[#allocation2 + $0x150] sm:$0xff] }
 0x13d   : > { %v617_v34 = vpop.f32.mrb[2].mxu0  ;;  %v821_v31 = vld [vmem:[#allocation2 + $0x158] sm:$0xff] }
 0x13e   : > { %v626_v38 = vrot.slane %v617_v34, 7  ;;  %v619_v39 = vpop.f32.mrb[3].mxu0  ;;  %v631_v41 = vsel %vm624_vm3, %v621_v33, %v625_v30  ;;  %v825_v33 = vld [vmem:[#allocation2 + $0x178] sm:$0xff]  ;;  %v2614_v34 = vcombine.low %v812_v20, %v816_v21  ;;  %v872_v20 = vld [vmem:[#allocation2 + $0x2f0] sm:$0xff] }
 0x13f   : > { %v3384_v49 = vadd.f32 %v632_v42, %v631_v41  ;;  %v828_v39 = vld [vmem:[#allocation2 + $0x190] sm:$0xff]  ;;  %v829_v41 = vld [vmem:[#allocation2 + $0x198] sm:$0xff] }
 0x140   : > { %v3373_v43 = vadd.f32 %v634_v35, %v626_v38  ;;  %v627_v45 = vsel %vm624_vm3, %v625_v30, %v626_v38  ;;  %v824_v30 = vld [vmem:[#allocation2 + $0x170] sm:$0xff]  ;;  %v2616_v35 = vcombine.low %v813_v22, %v817_v23  ;;  %v2625_v38 = vcombine.high %v821_v31, %v825_v33  ;;  %v833_v42 = vld [vmem:[#allocation2 + $0x1b8] sm:$0xff] }
 0x141   : > { %v3378_v46 = vadd.f32 %v633_v40, %v627_v45  ;;  %v640_v58 = vsel %vm576_vm0, %v3384_v49, 0.0  ;;  %v2623_v36 = vcombine.high %v820_v29, %v824_v30  ;;  %v832_v40 = vld [vmem:[#allocation2 + $0x1b0] sm:$0xff]  ;;  %v2624_v45 = vcombine.low %v821_v31, %v825_v33  ;;  %v869_v21 = vld [vmem:[#allocation2 + $0x2d8] sm:$0xff] }
 0x142   : > { %v647_v48 = vsel %vm646_vm4, %v3373_v43, 0.0  ;;  %v873_v22 = vld [vmem:[#allocation2 + $0x2f8] sm:$0xff] }
 0x143   : > { %648 = vadd.xlane.f32.xlu0 %v647_v48  ;;  %v767_v50 = vpop.f32.mrb[4].mxu0  ;;  %v643_v51 = vsel %vm576_vm0, %v3378_v46, 0.0  ;;  %v2633_v48 = vcombine.high %v829_v41, %v833_v42  ;;  %v881_v31 = vld [vmem:[#allocation2 + $0x338] sm:$0xff] }
 0x144   : > { %v768_v52 = vadd.f32 %v767_v50, %v715_v44  ;;  %644 = vadd.xlane.f32.xlu1 %v643_v51  ;;  %v769_v53 = vpop.f32.mrb[5].mxu0  ;;  %v2622_v44 = vcombine.low %v820_v29, %v824_v30  ;;  %v836_v50 = vld [vmem:[#allocation2 + $0x1d0] sm:$0xff]  ;;  %v877_v30 = vld [vmem:[#allocation2 + $0x318] sm:$0xff] }
 0x145   : > { %v770_v54 = vadd.f32 %v769_v53, %v719_v47  ;;  %v771_v55 = vpop.f32.mrb[6].mxu0  ;;  %v2631_v47 = vcombine.high %v828_v39, %v832_v40  ;;  %v840_v51 = vld [vmem:[#allocation2 + $0x1f0] sm:$0xff]  ;;  %v841_v53 = vld [vmem:[#allocation2 + $0x1f8] sm:$0xff] }
 0x146   : > { %v774_v56 = vmax.f32 %v768_v52, 0.0  ;;  %v772_v57 = vpop.f32.mrb[7].mxu0  ;;  %v837_v52 = vld [vmem:[#allocation2 + $0x1d8] sm:$0xff]  ;;  %v2632_v55 = vcombine.low %v829_v41, %v833_v42  ;;  %v2638_v62 = vcombine.low %v836_v50, %v840_v51  ;;  %v880_v29 = vld [vmem:[#allocation2 + $0x330] sm:$0xff] }
 0x147   : > { %v775_v59 = vmax.f32 %v770_v54, 0.0  ;;  %641 = vadd.xlane.f32.xlu0 %v640_v58  ;;  %v2630_v54 = vcombine.low %v828_v39, %v832_v40  ;;  %v2641_v57 = vcombine.high %v837_v52, %v841_v53  ;;  %v844_v58 = vld [vmem:[#allocation2 + $0x210] sm:$0xff]  ;;  %v2640_v63 = vcombine.low %v837_v52, %v841_v53  ;;  %v885_v40 = vld [vmem:[#allocation2 + $0x358] sm:$0xff] }
 0x148   : > { %v3390_v2 = vpack.c.bf16 %v774_v56, %v774_v56  ;;  %v2639_v56 = vcombine.high %v836_v50, %v840_v51  ;;  %v888_v39 = vld [vmem:[#allocation2 + $0x370] sm:$0xff]  ;;  %v889_v41 = vld [vmem:[#allocation2 + $0x378] sm:$0xff] }
 0x149   : > { %v777_v1 = vpack.c.bf16 %v775_v59, %v775_v59  ;;  %v848_v59 = vld [vmem:[#allocation2 + $0x230] sm:$0xff]  ;;  %v893_v51 = vld [vmem:[#allocation2 + $0x398] sm:$0xff] }
 0x14a   : > { %v2646_v8 = vcombine.low %v844_v58, %v848_v59  ;;  %v896_v50 = vld [vmem:[#allocation2 + $0x3b0] sm:$0xff]  ;;  %v897_v52 = vld [vmem:[#allocation2 + $0x3b8] sm:$0xff] }
 0x14b   : > { %1620 = vmatprep.mubr.bf16.mxu1 %v777_v1  ;;  %1661 = vmatprep.mubr.bf16.mxu0 %v777_v1 }
 0x14c   : > { %1621 = vmatmul.mubr.bf16.vlgmr.msra.gmra.mrb[0].mxu1 %v3390_v2  ;;  %1662 = vmatmul.mubr.bf16.vlgmr.msra.gmra.mrb[8].mxu0 %v3390_v2 }
 0x14d   : > { %1671 = vmatpush1.bf16.msra.mxu1 %v2582_v24  ;;  %1712 = vmatpush1.bf16.msra.mxu0 %v2584_v25  ;;  %v2606_v24 = vcombine.low %v804_v12, %v808_v13  ;;  %v2608_v25 = vcombine.low %v805_v14, %v809_v15  ;;  %v864_v12 = vld [vmem:[#allocation2 + $0x2b0] sm:$0xff]  ;;  %v861_v13 = vld [vmem:[#allocation2 + $0x298] sm:$0xff] }
 0x14e   : > { %1702 = vmatprep.mubr.bf16.mxu1 %v777_v1  ;;  %1743 = vmatprep.mubr.bf16.mxu0 %v777_v1  ;;  %v2647_v1 = vcombine.high %v844_v58, %v848_v59  ;;  %v865_v14 = vld [vmem:[#allocation2 + $0x2b8] sm:$0xff]  ;;  %v904_v58 = vld [vmem:[#allocation2 + $0x3f0] sm:$0xff] }
 0x14f   : > { %1672 = vmatprep.subr.bf16.mxu1 %v2591_v4  ;;  %1713 = vmatprep.subr.bf16.mxu0 %v2593_v5  ;;  %v852_v4 = vld [vmem:[#allocation2 + $0x250] sm:$0xff]  ;;  %v901_v59 = vld [vmem:[#allocation2 + $0x3d8] sm:$0xff] }
 0x150   : > { %v856_v5 = vld [vmem:[#allocation2 + $0x270] sm:$0xff] }
 0x151   : > { %1673 = vmatpush1.bf16.msra.mxu1 %v2590_v9  ;;  %1714 = vmatpush1.bf16.msra.mxu0 %v2592_v10  ;;  %v2648_v9 = vcombine.low %v845_v60, %v849_v61  ;;  %v2655_v10 = vcombine.high %v852_v4, %v856_v5  ;;  %v2654_v15 = vcombine.low %v852_v4, %v856_v5  ;;  %v905_v60 = vld [vmem:[#allocation2 + $0x3f8] sm:$0xff]  ;;  %v2939_v5 = vld [vmem:[%s3718_s11 + $0x40] sm:$0xff]  }
 0x152   : > { %1674 = vmatprep.subr.bf16.mxu1 %v2599_v11  ;;  %1715 = vmatprep.subr.bf16.mxu0 %v2601_v0  ;;  %v2657_v11 = vcombine.high %v853_v6, %v857_v7  ;;  %v860_v0 = vld [vmem:[#allocation2 + $0x290] sm:$0xff]  ;;  %v2704_v4 = vcombine.low %v901_v59, %v905_v60 }
 0x153   : > { %v2662_v23 = vcombine.low %v860_v0, %v864_v12 }
 0x155   : > { %1675 = vmatpush1.bf16.msra.mxu1 %v2598_v16  ;;  %1716 = vmatpush1.bf16.msra.mxu0 %v2600_v17  ;;  %v2656_v16 = vcombine.low %v853_v6, %v857_v7  ;;  %v2663_v17 = vcombine.high %v860_v0, %v864_v12  ;;  %v2940_v6 = vld [vmem:[%s3718_s11] sm:$0xff]   ;;  %v2941_v7 = vld [vmem:[%s3718_s11 + $0x48] sm:$0xff]  }
 0x156   : > { %1676 = vmatprep.subr.bf16.mxu1 %v2607_v18  ;;  %1717 = vmatprep.subr.bf16.mxu0 %v2609_v19  ;;  %v2665_v18 = vcombine.high %v861_v13, %v865_v14  ;;  %v868_v19 = vld [vmem:[#allocation2 + $0x2d0] sm:$0xff]  ;;  %v2947_v0 = vld [vmem:[%s3718_s11 + $0x60] sm:$0xff]  }
 0x157   : > { %v2670_v33 = vcombine.low %v868_v19, %v872_v20  ;;  %v2948_v12 = vld [vmem:[%s3718_s11 + $0x20] sm:$0xff]  }
 0x159   : > { %1677 = vmatpush1.bf16.msra.mxu1 %v2606_v24  ;;  %1718 = vmatpush1.bf16.msra.mxu0 %v2608_v25  ;;  %v2664_v24 = vcombine.low %v861_v13, %v865_v14  ;;  %v2671_v25 = vcombine.high %v868_v19, %v872_v20  ;;  %v2949_v13 = vld [vmem:[%s3718_s11 + $0x68] sm:$0xff]   ;;  %v2955_v19 = vld [vmem:[%s3718_s11 + $0xc0] sm:$0xff]  }
 0x15a   : > { %1678 = vmatprep.subr.bf16.mxu1 %v2615_v26  ;;  %1719 = vmatprep.subr.bf16.mxu0 %v2617_v27  ;;  %v2673_v26 = vcombine.high %v869_v21, %v873_v22  ;;  %v876_v27 = vld [vmem:[#allocation2 + $0x310] sm:$0xff]  ;;  %v2950_v14 = vld [vmem:[%s3718_s11 + $0x28] sm:$0xff]   ;;  %v2971_v20 = vld [vmem:[%s3718_s11 + $0x140] sm:$0xff]  }
 0x15b   : > { %v2678_v42 = vcombine.low %v876_v27, %v880_v29 }
 0x15d   : > { %1679 = vmatpush1.bf16.msra.mxu1 %v2614_v34  ;;  %1720 = vmatpush1.bf16.msra.mxu0 %v2616_v35  ;;  %v2672_v34 = vcombine.low %v869_v21, %v873_v22  ;;  %v2679_v35 = vcombine.high %v876_v27, %v880_v29  ;;  %v2973_v21 = vld [vmem:[%s3718_s11 + $0x100] sm:$0xff]   ;;  %v2975_v22 = vld [vmem:[%s3718_s11 + $0x148] sm:$0xff]  }
 0x15e   : > { %1680 = vmatprep.subr.bf16.mxu1 %v2623_v36  ;;  %1721 = vmatprep.subr.bf16.mxu0 %v2625_v38  ;;  %v2681_v36 = vcombine.high %v877_v30, %v881_v31  ;;  %v884_v38 = vld [vmem:[#allocation2 + $0x350] sm:$0xff] }
 0x15f   : > { %v2686_v53 = vcombine.low %v884_v38, %v888_v39 }
 0x161   : > { %1681 = vmatpush1.bf16.msra.mxu1 %v2622_v44  ;;  %1722 = vmatpush1.bf16.msra.mxu0 %v2624_v45  ;;  %v2680_v44 = vcombine.low %v877_v30, %v881_v31  ;;  %v2687_v45 = vcombine.high %v884_v38, %v888_v39  ;;  %v2983_v30 = vld [vmem:[%s3718_s11 + $0x158] sm:$0xff]  }
 0x162   : > { %1682 = vmatprep.subr.bf16.mxu1 %v2631_v47  ;;  %1723 = vmatprep.subr.bf16.mxu0 %v2633_v48  ;;  %v2689_v47 = vcombine.high %v885_v40, %v889_v41  ;;  %v892_v48 = vld [vmem:[#allocation2 + $0x390] sm:$0xff] }
 0x163   : > { %v2694_v61 = vcombine.low %v892_v48, %v896_v50 }
 0x165   : > { %1683 = vmatpush1.bf16.msra.mxu1 %v2630_v54  ;;  %1724 = vmatpush1.bf16.msra.mxu0 %v2632_v55  ;;  %v2688_v54 = vcombine.low %v885_v40, %v889_v41  ;;  %v2695_v55 = vcombine.high %v892_v48, %v896_v50  ;;  %v2987_v40 = vld [vmem:[%s3718_s11 + $0x160] sm:$0xff]   ;;  %v2995_v50 = vld [vmem:[%s3718_s11 + $0x170] sm:$0xff]  }
 0x166   : > { %1684 = vmatprep.subr.bf16.mxu1 %v2639_v56  ;;  %1725 = vmatprep.subr.bf16.mxu0 %v2641_v57  ;;  %v2697_v56 = vcombine.high %v893_v51, %v897_v52  ;;  %v900_v57 = vld [vmem:[#allocation2 + $0x3d0] sm:$0xff]  ;;  %v2989_v41 = vld [vmem:[%s3718_s11 + $0x120] sm:$0xff]  }
 0x169   : > { %1685 = vmatpush1.bf16.msra.mxu1 %v2638_v62  ;;  %1726 = vmatpush1.bf16.msra.mxu0 %v2640_v63  ;;  %v2696_v62 = vcombine.low %v893_v51, %v897_v52  ;;  %v2703_v63 = vcombine.high %v900_v57, %v904_v58  ;;  %v2997_v51 = vld [vmem:[%s3718_s11 + $0x130] sm:$0xff]   ;;  %v2999_v52 = vld [vmem:[%s3718_s11 + $0x178] sm:$0xff]  }
 0x16a   : > { %1686 = vmatprep.subr.bf16.mxu1 %v2647_v1  ;;  %1727 = vmatprep.subr.bf16.mxu0 %v2649_v3  ;;  %v2705_v1 = vcombine.high %v901_v59, %v905_v60  ;;  %v2702_v3 = vcombine.low %v900_v57, %v904_v58 }
 0x16d   : > { %1687 = vmatpush1.bf16.msra.mxu1 %v2646_v8  ;;  %1728 = vmatpush1.bf16.msra.mxu0 %v2648_v9  ;;  %v2942_v8 = vld [vmem:[%s3718_s11 + $0x8] sm:$0xff]   ;;  %v2943_v9 = vld [vmem:[%s3718_s11 + $0x50] sm:$0xff]  }
 0x16e   : > { %1688 = vmatprep.subr.bf16.mxu1 %v2655_v10  ;;  %1729 = vmatprep.subr.bf16.mxu0 %v2657_v11  ;;  %v2944_v10 = vld [vmem:[%s3718_s11 + $0x10] sm:$0xff]   ;;  %v2946_v11 = vld [vmem:[%s3718_s11 + $0x18] sm:$0xff]  }
 0x171   : > { %1689 = vmatpush1.bf16.msra.mxu1 %v2654_v15  ;;  %1730 = vmatpush1.bf16.msra.mxu0 %v2656_v16  ;;  %v2951_v15 = vld [vmem:[%s3718_s11 + $0x70] sm:$0xff]  }
 0x172   : > { %1690 = vmatprep.subr.bf16.mxu1 %v2663_v17  ;;  %1731 = vmatprep.subr.bf16.mxu0 %v2665_v18  ;;  %v2952_v16 = vld [vmem:[%s3718_s11 + $0x30] sm:$0xff]   ;;  %v2953_v17 = vld [vmem:[%s3718_s11 + $0x78] sm:$0xff]  }
 0x173   : > { %v2954_v18 = vld [vmem:[%s3718_s11 + $0x38] sm:$0xff]  }
 0x175   : > { %1691 = vmatpush1.bf16.msra.mxu1 %v2662_v23  ;;  %1732 = vmatpush1.bf16.msra.mxu0 %v2664_v24  ;;  %v2977_v23 = vld [vmem:[%s3718_s11 + $0x108] sm:$0xff]   ;;  %v2979_v24 = vld [vmem:[%s3718_s11 + $0x150] sm:$0xff]  }
 0x176   : > { %1692 = vmatprep.subr.bf16.mxu1 %v2671_v25  ;;  %1733 = vmatprep.subr.bf16.mxu0 %v2673_v26  ;;  %v2981_v25 = vld [vmem:[%s3718_s11 + $0x110] sm:$0xff]  }
 0x179   : > { %1693 = vmatpush1.bf16.msra.mxu1 %v2670_v33  ;;  %1734 = vmatpush1.bf16.msra.mxu0 %v2672_v34  ;;  %v2985_v33 = vld [vmem:[%s3718_s11 + $0x118] sm:$0xff]  }
 0x17a   : > { %1694 = vmatprep.subr.bf16.mxu1 %v2679_v35  ;;  %1735 = vmatprep.subr.bf16.mxu0 %v2681_v36 }
 0x17d   : > { %1695 = vmatpush1.bf16.msra.mxu1 %v2678_v42  ;;  %1736 = vmatpush1.bf16.msra.mxu0 %v2680_v44 }
 0x17e   : > { %1696 = vmatprep.subr.bf16.mxu1 %v2687_v45  ;;  %1737 = vmatprep.subr.bf16.mxu0 %v2689_v47  ;;  %v2991_v45 = vld [vmem:[%s3718_s11 + $0x168] sm:$0xff]  }
 0x181   : > { %1697 = vmatpush1.bf16.msra.mxu1 %v2686_v53  ;;  %1738 = vmatpush1.bf16.msra.mxu0 %v2688_v54  ;;  %v3001_v53 = vld [vmem:[%s3718_s11 + $0x138] sm:$0xff]   ;;  %v3516_v54 = vld [vmem:[%s3717_s10] sm:$0xff] }
 0x182   : > { %1698 = vmatprep.subr.bf16.mxu1 %v2695_v55  ;;  %1739 = vmatprep.subr.bf16.mxu0 %v2697_v56  ;;  %v1562_v55 = vsub.s32 3, %v3353_v28  ;;  %v1551_v56 = vrot.slane %v3516_v54, %v714_v32  ;;  %v1555_v57 = vrot.slane %v3516_v54, %v718_v37  ;;  %v2956_v37 = vld [vmem:[%s3718_s11 + $0x80] sm:$0xff]  }
 0x184   : > { %v1563_v58 = vrot.slane %v3516_v54, %v1562_v55 }
 0x185   : > { %1699 = vmatpush1.bf16.msra.mxu1 %v2694_v61  ;;  %1740 = vmatpush1.bf16.msra.mxu0 %v2696_v62 }
 0x186   : > { %1700 = vmatprep.subr.bf16.mxu1 %v2703_v63  ;;  %1741 = vmatprep.subr.bf16.mxu0 %v2705_v1 }
 0x189   : > { %1701 = vmatpush1.bf16.msra.mxu1 %v2702_v3  ;;  %1742 = vmatpush1.bf16.msra.mxu0 %v2704_v4 }
 0x18a   : > { %2777 = vmatprep.subr.bf16.mxu1 %v2939_v5  ;;  %2821 = vmatprep.subr.bf16.mxu0 %v2971_v20  ;;  %v2965_v20 = vld [vmem:[%s3718_s11 + $0xe8] sm:$0xff]  }
 0x18c   : > { %1703 = vmatmul.mubr.bf16.vlgmr.msra.gmra.mrb[4].mxu1 %v3390_v2  ;;  %1744 = vmatmul.mubr.bf16.vlgmr.msra.gmra.mrb[12].mxu0 %v3390_v2  ;;  %v2945_v2 = vld [vmem:[%s3718_s11 + $0x58] sm:$0xff]  }
 0x18d   : > { %2778 = vmatpush3.bf16.msra.mxu1 %v2940_v6  ;;  %2822 = vmatpush3.bf16.msra.mxu0 %v2973_v21  ;;  %v2966_v21 = vld [vmem:[%s3718_s11 + $0xa8] sm:$0xff]  }
 0x18e   : > { %2779 = vmatprep.subr.bf16.mxu1 %v2941_v7  ;;  %2823 = vmatprep.subr.bf16.mxu0 %v2975_v22 }
 0x191   : > { %2780 = vmatpush3.bf16.msra.mxu1 %v2942_v8  ;;  %2824 = vmatpush3.bf16.msra.mxu0 %v2977_v23  ;;  %v2967_v23 = vld [vmem:[%s3718_s11 + $0xf0] sm:$0xff]  }
 0x192   : > { %2781 = vmatprep.subr.bf16.mxu1 %v2943_v9  ;;  %2825 = vmatprep.subr.bf16.mxu0 %v2979_v24  ;;  %v2968_v24 = vld [vmem:[%s3718_s11 + $0xb0] sm:$0xff]  }
 0x195   : > { %2782 = vmatpush3.bf16.msra.mxu1 %v2944_v10  ;;  %2826 = vmatpush3.bf16.msra.mxu0 %v2981_v25 }
 0x196   : > { %2783 = vmatprep.subr.bf16.mxu1 %v2945_v2  ;;  %2827 = vmatprep.subr.bf16.mxu0 %v2983_v30  ;;  %v2972_v30 = vld [vmem:[%s3718_s11 + $0x1c0] sm:$0xff]  }
 0x199   : > { %2784 = vmatpush3.bf16.msra.mxu1 %v2946_v11  ;;  %2828 = vmatpush3.bf16.msra.mxu0 %v2985_v33  ;;  %v2957_v11 = vld [vmem:[%s3718_s11 + $0xc8] sm:$0xff]  }
 0x19a   : > { %2785 = vmatprep.subr.bf16.mxu1 %v2947_v0  ;;  %2829 = vmatprep.subr.bf16.mxu0 %v2987_v40  ;;  %v2982_v40 = vld [vmem:[%s3718_s11 + $0x190] sm:$0xff]  }
 0x19d   : > { %2786 = vmatpush3.bf16.msra.mxu1 %v2948_v12  ;;  %2830 = vmatpush3.bf16.msra.mxu0 %v2989_v41  ;;  %v2958_v12 = vld [vmem:[%s3718_s11 + $0x88] sm:$0xff]   ;;  %v2984_v41 = vld [vmem:[%s3718_s11 + $0x1d8] sm:$0xff]  }
 0x19e   : > { %2787 = vmatprep.subr.bf16.mxu1 %v2949_v13  ;;  %2831 = vmatprep.subr.bf16.mxu0 %v2991_v45  ;;  %v2959_v13 = vld [vmem:[%s3718_s11 + $0xd0] sm:$0xff]   ;;  %v2992_v45 = vld [vmem:[%s3718_s11 + $0x1e8] sm:$0xff]  }
 0x1a1   : > { %2788 = vmatpush3.bf16.msra.mxu1 %v2950_v14  ;;  %v2960_v14 = vld [vmem:[%s3718_s11 + $0x90] sm:$0xff]  }
 0x1a2   : > { %2789 = vmatprep.subr.bf16.mxu1 %v2951_v15  ;;  %v2961_v15 = vld [vmem:[%s3718_s11 + $0xd8] sm:$0xff]  }
 0x1a5   : > { %2790 = vmatpush3.bf16.msra.mxu1 %v2952_v16  ;;  %v2962_v16 = vld [vmem:[%s3718_s11 + $0x98] sm:$0xff]  }
 0x1a6   : > { %2791 = vmatprep.subr.bf16.mxu1 %v2953_v17  ;;  %v2963_v17 = vld [vmem:[%s3718_s11 + $0xe0] sm:$0xff]  }
 0x1a9   : > { %2792 = vmatpush3.bf16.msra.mxu1 %v2954_v18  ;;  %v2964_v18 = vld [vmem:[%s3718_s11 + $0xa0] sm:$0xff]  }
 0x1aa   : > { %2799 = vmatprep.subr.bf16.mxu1 %v2955_v19  ;;  %v1558_v19 = vsub.s32 2, %v3353_v28 }
 0x1ac   : > { %v1559_v22 = vrot.slane %v3516_v54, %v1558_v19 }
 0x1d0   : > { %v649_v26 = vpop.xlane.xlu0 %648 }
 0x1d1   : > { %v653_v27 = vmul.f32 0.015625, %v649_v26  ;;  %v645_v29 = vpop.xlane.xlu1 %644  ;;  %v2969_v26 = vld [vmem:[%s3718_s11 + $0xf8] sm:$0xff]  }
 0x1d2   : > { %v652_v31 = vmul.f32 0.015625, %v645_v29 }
 0x1d3   : > { %v3472_v34 = vsub.f32 %v3373_v43, %v653_v27  ;;  %v2970_v27 = vld [vmem:[%s3718_s11 + $0xb8] sm:$0xff]  }
 0x1d4   : > { %v3475_v35 = vsub.f32 %v3378_v46, %v652_v31  ;;  %v642_v36 = vpop.xlane.xlu0 %641  ;;  %v2974_v31 = vld [vmem:[%s3718_s11 + $0x180] sm:$0xff]  }
 0x1d5   : > { %v651_v38 = vmul.f32 0.015625, %v642_v36  ;;  %v659_v39 = vmul.f32 %v3472_v34, %v3472_v34  ;;  %v2976_v36 = vld [vmem:[%s3718_s11 + $0x1c8] sm:$0xff]  }
 0x1d6   : > { %v658_v42 = vmul.f32 %v3475_v35, %v3475_v35 }
 0x1d7   : > { %v3486_v43 = vsub.f32 %v3384_v49, %v651_v38  ;;  %v666_v46 = vsel %vm646_vm4, %v659_v39, 0.0  ;;  %v2993_v49 = vld [vmem:[%s3718_s11 + $0x128] sm:$0xff]   ;;  %v2980_v39 = vld [vmem:[%s3718_s11 + $0x1d0] sm:$0xff]  }
 0x1d8   : > { %667 = vadd.xlane.f32.xlu1 %v666_v46  ;;  %v663_v48 = vsel %vm576_vm0, %v658_v42, 0.0  ;;  %2832 = vmatpush3.bf16.msra.mxu0 %v2993_v49  ;;  %v2978_v38 = vld [vmem:[%s3718_s11 + $0x188] sm:$0xff]   ;;  %v2986_v46 = vld [vmem:[%s3718_s11 + $0x198] sm:$0xff]   ;;  %v2988_v42 = vld [vmem:[%s3718_s11 + $0x1e0] sm:$0xff]   ;;  %v1566_v49 = vsub.s32 4, %v3353_v28 }
 0x1d9   : > { %v657_v44 = vmul.f32 %v3486_v43, %v3486_v43  ;;  %2833 = vmatprep.subr.bf16.mxu0 %v2995_v50  ;;  %v1570_v50 = vsub.s32 5, %v3353_v28 }
 0x1db   : > { %v660_v47 = vsel %vm576_vm0, %v657_v44, 0.0  ;;  %v2990_v44 = vld [vmem:[%s3718_s11 + $0x1a0] sm:$0xff]  }
 0x1dc   : > { %661 = vadd.xlane.f32.xlu0 %v660_v47  ;;  %664 = vadd.xlane.f32.xlu1 %v663_v48  ;;  %v1574_v47 = vsub.s32 6, %v3353_v28  ;;  %v2994_v48 = vld [vmem:[%s3718_s11 + $0x1a8] sm:$0xff]  }
 0x1dd   : > { %2834 = vmatpush3.bf16.msra.mxu0 %v2997_v51  ;;  %v1578_v51 = vsub.s32 7, %v3353_v28  ;;  %v3000_v28 = vld [vmem:[%s3718_s11 + $0x1f8] sm:$0xff]  }
 0x1de   : > { %2835 = vmatprep.subr.bf16.mxu0 %v2999_v52  ;;  %v2996_v52 = vld [vmem:[%s3718_s11 + $0x1f0] sm:$0xff]   ;;  %v1575_v55 = vrot.slane %v3516_v54, %v1574_v47 }
 0x1e1   : > { %2836 = vmatpush3.bf16.msra.mxu0 %v3001_v53  ;;  %v1567_v53 = vrot.slane %v3516_v54, %v1566_v49 }
 0x21f   : > { %v1622_v59 = vpop.f32.mrb[0].mxu1  ;;  %v1663_v60 = vpop.f32.mrb[8].mxu0 }
 0x220   : > { %v1623_v61 = vadd.f32 %v1622_v59, %v1551_v56  ;;  %v1624_v62 = vpop.f32.mrb[1].mxu1  ;;  %v1665_v63 = vpop.f32.mrb[9].mxu0  ;;  %v1664_v25 = vadd.f32 %v1663_v60, %v1559_v22  ;;  %v1571_v56 = vrot.slane %v3516_v54, %v1570_v50 }
 0x221   : > { %v1625_v1 = vadd.f32 %v1624_v62, %v1555_v57  ;;  %v1666_v3 = vadd.f32 %v1665_v63, %v1563_v58  ;;  %v1626_v4 = vpop.f32.mrb[2].mxu1  ;;  %v1667_v5 = vpop.f32.mrb[10].mxu0  ;;  %v1579_v57 = vrot.slane %v3516_v54, %v1578_v51  ;;  %v2998_v58 = vld [vmem:[%s3718_s11 + $0x1b0] sm:$0xff]   ;;  %v3002_v54 = vld [vmem:[%s3718_s11 + $0x1b8] sm:$0xff]  }
 0x222   : > { %v1752_v6 = vmax.f32 %v1623_v61, 0.0  ;;  %v1627_v7 = vpop.f32.mrb[3].mxu1  ;;  %v1668_v8 = vpop.f32.mrb[11].mxu0  ;;  %v1754_v29 = vmax.f32 %v1664_v25, 0.0  ;;  %v2573_v25 = vld [vmem:[%s3712_s5] ss:$0 sm:$0xff] }
 0x223   : > { %v1753_v9 = vmax.f32 %v1625_v1, 0.0  ;;  %v1755_v32 = vmax.f32 %v1666_v3, 0.0 }
 0x224   : > { %v1760_v2 = vpack.c.bf16 %v1752_v6, %v1752_v6  ;;  %v1762_v33 = vpack.c.bf16 %v1754_v29, %v1754_v29 }
 0x225   : > { %v1761_v10 = vpack.c.bf16 %v1753_v9, %v1753_v9  ;;  %v1763_v0 = vpack.c.bf16 %v1755_v32, %v1755_v32 }
 0x227   : > { %2313 = vmatprep.mubr.bf16.mxu1 %v1761_v10 }
 0x228   : > { %2314 = vmatmul.mubr.bf16.vlgmr.msra.gmra.mrb[8].mxu1 %v1760_v2 }
 0x229   : > { %2800 = vmatpush3.bf16.msra.mxu1 %v2956_v37  ;;  %2353 = vmatprep.mubr.bf16.mxu1 %v1763_v0 }
 0x22a   : > { %2801 = vmatprep.subr.bf16.mxu1 %v2957_v11 }
 0x22d   : > { %2802 = vmatpush3.bf16.msra.mxu1 %v2958_v12 }
 0x22e   : > { %2803 = vmatprep.subr.bf16.mxu1 %v2959_v13 }
 0x231   : > { %2804 = vmatpush3.bf16.msra.mxu1 %v2960_v14 }
 0x232   : > { %2805 = vmatprep.subr.bf16.mxu1 %v2961_v15 }
 0x235   : > { %2806 = vmatpush3.bf16.msra.mxu1 %v2962_v16 }
 0x236   : > { %2807 = vmatprep.subr.bf16.mxu1 %v2963_v17 }
 0x239   : > { %2808 = vmatpush3.bf16.msra.mxu1 %v2964_v18 }
 0x23a   : > { %2809 = vmatprep.subr.bf16.mxu1 %v2965_v20 }
 0x23d   : > { %2810 = vmatpush3.bf16.msra.mxu1 %v2966_v21 }
 0x23e   : > { %2811 = vmatprep.subr.bf16.mxu1 %v2967_v23  ;;  %v2572_v23 = vld [vmem:[%s3711_s4] ss:$0 sm:$0xff] }
 0x241   : > { %2812 = vmatpush3.bf16.msra.mxu1 %v2968_v24 }
 0x242   : > { %2813 = vmatprep.subr.bf16.mxu1 %v2969_v26 }
 0x245   : > { %2814 = vmatpush3.bf16.msra.mxu1 %v2970_v27 }
 0x246   : > { %2843 = vmatprep.subr.bf16.mxu1 %v2972_v30 }
 0x248   : > { %2354 = vmatmul.mubr.bf16.vlgmr.msra.gmra.mrb[12].mxu1 %v1762_v33 }
 0x249   : > { %2844 = vmatpush3.bf16.msra.mxu1 %v2974_v31 }
 0x24a   : > { %2845 = vmatprep.subr.bf16.mxu1 %v2976_v36 }
 0x24d   : > { %2846 = vmatpush3.bf16.msra.mxu1 %v2978_v38 }
 0x24e   : > { %2847 = vmatprep.subr.bf16.mxu1 %v2980_v39 }
 0x251   : > { %2848 = vmatpush3.bf16.msra.mxu1 %v2982_v40 }
 0x252   : > { %2849 = vmatprep.subr.bf16.mxu1 %v2984_v41 }
 0x255   : > { %2850 = vmatpush3.bf16.msra.mxu1 %v2986_v46 }
 0x256   : > { %2851 = vmatprep.subr.bf16.mxu1 %v2988_v42 }
 0x259   : > { %2852 = vmatpush3.bf16.msra.mxu1 %v2990_v44  ;;  %v1896_v44 = vld [vmem:[%s3719_s12] sm:$0x1] }
 0x25a   : > { %2853 = vmatprep.subr.bf16.mxu1 %v2992_v45 }
 0x25d   : > { %2854 = vmatpush3.bf16.msra.mxu1 %v2994_v48 }
 0x25e   : > { %2855 = vmatprep.subr.bf16.mxu1 %v2996_v52 }
 0x25f   : > { %v1704_v59 = vpop.f32.mrb[4].mxu1  ;;  %v1745_v60 = vpop.f32.mrb[12].mxu0 }
 0x260   : > { %v1705_v61 = vadd.f32 %v1704_v59, %v1567_v53  ;;  %v1746_v62 = vadd.f32 %v1745_v60, %v1575_v55  ;;  %v1706_v63 = vpop.f32.mrb[5].mxu1  ;;  %v1747_v1 = vpop.f32.mrb[13].mxu0 }
 0x261   : > { %v1707_v3 = vadd.f32 %v1706_v63, %v1571_v56  ;;  %v1748_v4 = vadd.f32 %v1747_v1, %v1579_v57  ;;  %v1708_v5 = vpop.f32.mrb[6].mxu1  ;;  %v1749_v6 = vpop.f32.mrb[14].mxu0  ;;  %2856 = vmatpush3.bf16.msra.mxu1 %v2998_v58 }
 0x262   : > { %v1756_v7 = vmax.f32 %v1705_v61, 0.0  ;;  %v1758_v8 = vmax.f32 %v1746_v62, 0.0  ;;  %v1709_v9 = vpop.f32.mrb[7].mxu1  ;;  %v1750_v32 = vpop.f32.mrb[15].mxu0  ;;  %2857 = vmatprep.subr.bf16.mxu1 %v3000_v28 }
 0x263   : > { %v1757_v10 = vmax.f32 %v1707_v3, 0.0  ;;  %v1759_v37 = vmax.f32 %v1748_v4, 0.0 }
 0x264   : > { %v1764_v12 = vpack.c.bf16 %v1756_v7, %v1756_v7  ;;  %v1766_v13 = vpack.c.bf16 %v1758_v8, %v1758_v8 }
 0x265   : > { %v1765_v2 = vpack.c.bf16 %v1757_v10, %v1757_v10  ;;  %v1767_v11 = vpack.c.bf16 %v1759_v37, %v1759_v37  ;;  %2858 = vmatpush3.bf16.msra.mxu1 %v3002_v54  ;;  %v668_v0 = vpop.xlane.xlu1 %667 }
 0x266   : > { %v671_v14 = vmul.f32 0.015625, %v668_v0 }
 0x267   : > { %2393 = vmatprep.mubr.bf16.mxu0 %v1765_v2  ;;  %2433 = vmatprep.mubr.bf16.mxu1 %v1767_v11 }
 0x268   : > { %v674_v15 = vadd.f32 1e-05, %v671_v14  ;;  %2394 = vmatmul.mubr.bf16.vlgmr.msra.gmra.mrb[16].mxu0 %v1764_v12  ;;  %2434 = vmatmul.mubr.bf16.vlgmr.msra.gmra.mrb[16].mxu1 %v1766_v13 }
 0x269   : > { %v662_v16 = vpop.xlane.xlu0 %661  ;;  %v665_v17 = vpop.xlane.xlu1 %664 }
 0x26a   : > { %3003 = vrsqrt.f32 %v674_v15  ;;  %v669_v18 = vmul.f32 0.015625, %v662_v16  ;;  %v670_v19 = vmul.f32 0.015625, %v665_v17 }
 0x26c   : > { %v672_v20 = vadd.f32 1e-05, %v669_v18  ;;  %v673_v21 = vadd.f32 1e-05, %v670_v19 }
 0x26e   : > { %3005 = vrsqrt.f32 %v672_v20 }
 0x26f   : > { %3007 = vrsqrt.f32 %v673_v21 }
 0x274   : > { %v3004_v22 = vpop.eup %3003 }
 0x275   : > { %v680_v24 = vmul.f32 %v3004_v22, %v3472_v34  ;;  %v3109_v34 = vmov 0.0  }
 0x276   : > { %2450 = vst.msk [vmem:[%s3641_s30 + $0x18] sm:$0xff] %vm576_vm0, %v3109_v34 }
 0x277   : > { %v689_v26 = vmul.f32 %v2572_v23, %v680_v24 }
 0x278   : > { %v3006_v27 = vpop.eup %3005 }
 0x279   : > { %v3008_v29 = vpop.eup %3007  ;;  %v678_v30 = vmul.f32 %v3006_v27, %v3486_v43  ;;  %v698_v31 = vadd.f32 %v2573_v25, %v689_v26 }
 0x27a   : > { %v679_v33 = vmul.f32 %v3008_v29, %v3475_v35 }
 0x27b   : > { %v687_v36 = vmul.f32 %v2572_v23, %v678_v30 }
 0x27c   : > { %v688_v38 = vmul.f32 %v2572_v23, %v679_v33 }
 0x27d   : > { %v696_v39 = vadd.f32 %v2573_v25, %v687_v36 }
 0x27e   : > { %v697_v40 = vadd.f32 %v2573_v25, %v688_v38 }
 0x27f   : > { %2447 = vst.msk [vmem:[%s3641_s30] sm:$0xff] %vm576_vm0, %v696_v39 }
 0x280   : > { %2448 = vst.msk [vmem:[%s3641_s30 + $0x8] sm:$0xff] %vm576_vm0, %v697_v40 }
 0x2fb   : > { %v2793_v43 = vpop.f32.mrb[8].mxu1 }
 0x2fc   : > { %v2794_v41 = vpop.f32.mrb[9].mxu1 }
 0x2fd   : > { %v2795_v46 = vadd.f32 %v2794_v41, %v2793_v43  ;;  %v2796_v35 = vpop.f32.mrb[10].mxu1 }
 0x2fe   : > { %v2797_v42 = vpop.f32.mrb[11].mxu1 }
 0x2ff   : > { %v2316_v47 = vadd.f32 %v2795_v46, %v1896_v44 }
 0x31b   : > { %v2815_v45 = vpop.f32.mrb[12].mxu1 }
 0x31c   : > { %v2816_v49 = vpop.f32.mrb[13].mxu1 }
 0x31d   : > { %v2817_v48 = vadd.f32 %v2816_v49, %v2815_v45  ;;  %v2818_v50 = vpop.f32.mrb[14].mxu1 }
 0x31e   : > { %v2819_v51 = vpop.f32.mrb[15].mxu1 }
 0x31f   : > { %v2356_v52 = vadd.f32 %v2817_v48, %v2316_v47 }
 0x33b   : > { %v2837_v53 = vpop.f32.mrb[16].mxu0  ;;  %v2859_v55 = vpop.f32.mrb[16].mxu1 }
 0x33c   : > { %v2838_v56 = vpop.f32.mrb[17].mxu0  ;;  %v2860_v57 = vpop.f32.mrb[17].mxu1 }
 0x33d   : > { %v2839_v58 = vadd.f32 %v2838_v56, %v2837_v53  ;;  %v2861_v28 = vadd.f32 %v2860_v57, %v2859_v55  ;;  %v2840_v59 = vpop.f32.mrb[18].mxu0  ;;  %v2862_v60 = vpop.f32.mrb[18].mxu1 }
 0x33e   : > { %v2841_v61 = vpop.f32.mrb[19].mxu0  ;;  %v2863_v62 = vpop.f32.mrb[19].mxu1 }
 0x33f   : > { %v2396_v63 = vadd.f32 %v2839_v58, %v2356_v52 }
 0x341   : > { %v2436_v1 = vadd.f32 %v2861_v28, %v2396_v63 }
 0x343   : > { %v2442_v3 = vrot.slane %v2436_v1, 7 }
 0x345   : > { %v2444_v4 = vsel %vm624_vm3, %v698_v31, %v2442_v3 }
 0x346   : > { %v2446_v5 = vsel %vm2445_vm5, %v2444_v4, 0.0 }
 0x347   : > { %2449 = vst.msk [vmem:[%s3641_s30 + $0x10] sm:$0xff] %vm576_vm0, %v2446_v5 }
 0x348   : > { %3050 = shalt.err (!%p3047_p7)
}
 0x349   : > { %s3051_s21 = scalar_lea.hbm %s3657_s23, 512  ;;  %s3055_s14 = scalar_lea.hbm %s3720_s13, 1024 }
 0x34a   : > { %p3052_p8 = scmp.ne.s32.totalorder %s3657_s23, %s3051_s21  ;;  %p3056_p1 = scmp.lt.u32.totalorder %s3657_s23, %s3720_s13 }
 0x34b   : > { %p3057_p0 = scmp.lt.u32.totalorder %s3055_s14, %s3051_s21  ;;  %p3059_p6 = scmp.lt.u32.totalorder %s3051_s21, %s3657_s23 }
 0x34c   : > { %p3053_p11 = pnand %p3052_p8, %p3737_p9 }
 0x34d   : > { %p3058_p5 = por %p3057_p0, %p3056_p1 }
 0x34e   : > { %p3054_p13 = pneg %p3053_p11 }
 0x34f   : > { %p3060_p10 = por %p3059_p6, %p3058_p5 }
 0x351   : > { %p3061_p12 = pnand %p3060_p10, %p3054_p13 }
 0x353   : > { %3064 = shalt.err (!%p3061_p12)
}
 0x354   : > { %s3111_s17 = smov 128   ;;  %s3112_s16 = smov 8  }
 0x355   : > { %2869 = dma.vmem_to_hbm [thread:$0]  (%p3737_p9), %s3659_s20, 512, %s3657_s23, %s3666_s29, %s3111_s17, %s3111_s17, %s3112_s16  }
 0x356 PF: > { %p2881_p2 = scmp.ge.s32.totalorder %s3103_s28, 2  ;;  %s2480_s27 = sand.u32 1, %s3091_s25  }
 0x357   : > { %p3738_p3 = scmp.ne.s32.totalorder %s3731_s19, 0  ;;  %s2481_s21 = scalar_lea.sflag [#allocation4], %s2480_s27 }
 0x359   : > { %p2876_p4 = pnand %p2881_p2, %p3738_p3 }
 0x35b   : > { %3086 = dma.done.wait (!%p2876_p4), %s2481_s21, 512  }
 0x35c   : > { %3088 = vsyncadd (!%p2876_p4), %s2481_s21, 4294966784  ;;  %s3739_s28 = sld [smem:[#allocation9_spill]]  ;;  %s3740_s30 = sld [smem:[#allocation8_spill]] }
 0x35d   : > { %s3741_s27 = sld [smem:[#allocation10_spill]]  ;;  %s3742_s25 = smov %s3095_s26 }
 0x362   : > { %p24_p7 = scmp.ge.s32.totalorder %s3739_s28, 4   ;;  %s3743_s26 = smov %s3740_s30 }
 0x364   :  { %26 = sbr.rel (!%p24_p7) target bundleno = 4 (0x4), region = 115 }
 0x36b   :  { %2486 = vsyncpa [#allocation3], 1 }
 0x36c   :  { %2488 = vsyncpa [#allocation3 + $0x1], 1 }
 0x36d   :  { %2489 = vsyncpa [#allocation4], 1 }
 0x36e   :  { %2491 = vsyncpa [#allocation4 + $0x1], 1 }

</bundles_post_ra>
